<compile_context>
chip_gen: v7x
topology: tpu7x:2x2x1
jax: 0.10.0
libtpu: 0.0.40
codegen_flags: <defaults>
</compile_context>

<pallas_src>
import functools

import jax
import jax.numpy as jnp
import numpy as np
from jax.experimental import pallas as pl
from jax.experimental.pallas import tpu as pltpu


# ----------------------------------------------------------------------------
# Fused Pallas kernel: conv stack -> fc -> LayerNorm -> regression MLP
# ----------------------------------------------------------------------------
def _fused_forward_kernel(*refs, conv_dims, n_reg, ln_eps=1e-5):
    """refs order:
         xs_ref,
         (wbd_0, bias_0), ..., (wbd_{L-1}, bias_{L-1}),      # per conv layer
         fcw, fcb, ln_g, ln_b,
         (reg_w_0, reg_b_0), ..., (reg_w_{n_reg-1}, reg_b_{n_reg-1}),
         o_ref
    """
    it = iter(refs)
    xs_ref = next(it)
    conv_refs = [(next(it), next(it)) for _ in conv_dims]
    fcw_ref, fcb_ref, g_ref, beta_ref = next(it), next(it), next(it), next(it)
    reg_refs = [(next(it), next(it)) for _ in range(n_reg)]
    o_ref = next(it)

    # Conv stack: each layer is a sum of "row-shift + matmul" taps.  The column shift
    # of each tap is folded into the off-diagonal block structure of its precomputed
    # weight, so the LHS operand is always a full-width, unit-stride row slice.
    x = xs_ref[0]                                               # (rows_in, cols_in)
    for l, ((wbd_ref, b_ref), (oh, ow, f)) in enumerate(zip(conv_refs, conv_dims)):
        shifts = ([(di, dj) for di in range(2) for dj in range(2)] if l == 0
                  else [(ki, kj) for ki in range(3) for kj in range(3)])
        acc = jnp.zeros((oh, ow * f), jnp.float32)
        for t, (ri, _cj) in enumerate(shifts):
            lhs = x[ri:ri + oh, :]
            acc = acc + jnp.dot(lhs, wbd_ref[t],
                                preferred_element_type=jnp.float32)
        x = jnp.maximum(acc + b_ref[...], 0.0)                  # ReLU after every conv

    # fc: PyTorch's channel-major flatten is folded into fcw's row permutation, so the
    # (OH, OW*F) activation contracts row-by-row against (OW*F)-row slabs of fcw.
    oh, ow, f = conv_dims[-1]
    rw = ow * f
    fcw = fcw_ref[...]
    z = fcb_ref[...]
    for r in range(oh):
        z = z + jnp.dot(x[r:r + 1, :], fcw[r * rw:(r + 1) * rw, :],
                        preferred_element_type=jnp.float32)

    # LayerNorm over the feature dim (eps matches nn.LayerNorm default)
    mu = jnp.mean(z, axis=-1, keepdims=True)
    zc = z - mu
    var = jnp.mean(zc * zc, axis=-1, keepdims=True)
    z = zc * jax.lax.rsqrt(var + ln_eps) * g_ref[...] + beta_ref[...]

    # Regression MLP: [Linear -> ReLU]*n_hidden -> Linear (last layer zero-padded to a
    # lane-dense width; padded columns stay exactly 0 and are sliced off outside).
    a = z
    for i, (w_ref, b_ref) in enumerate(reg_refs):
        a = jnp.dot(a, w_ref[...], preferred_element_type=jnp.float32) + b_ref[...]
        if i < n_reg - 1:
            a = jnp.maximum(a, 0.0)
    o_ref[0] = a


# ----------------------------------------------------------------------------
# One-time host-side weight preparation (pure permutations / constant folds)
# ----------------------------------------------------------------------------
def prepare_fused_params(params, obs_shape):
    C, H, W = obs_shape
    assert H % 2 == 0 and W % 2 == 0, "space-to-depth needs even spatial dims"
    Hh, Wh = H // 2, W // 2
    s2d_c = 4 * C
    f32 = jnp.float32

    conv_wbd, conv_bias, conv_dims = [], [], []

    # ---- first conv: kernel 3, stride 2, expressed over the space-to-depth layout ----
    w0, b0, s0 = params["convs"][0]
    assert s0 == 2 and w0.shape[2] == 3 and w0.shape[3] == 3
    F0 = w0.shape[0]
    w0 = w0.astype(f32) * (1.0 / 255.0)              # fold obs/255. into the weights
    oh0 = (H - 3) // 2 + 1
    ow0 = (W - 3) // 2 + 1
    taps = []
    for di in range(2):
        for dj in range(2):
            blocks = []
            for qr in range(2):
                for qc in range(2):
                    ki, kj = 2 * di + qr, 2 * dj + qc
                    if ki < 3 and kj < 3:
                        blocks.append(jnp.transpose(w0[:, :, ki, kj]))   # (C, F0)
                    else:
                        blocks.append(jnp.zeros((C, F0), f32))
            tap = jnp.concatenate(blocks, axis=0)                        # (4C, F0)
            # Column shift dj folded into an off-diagonal block structure:
            # input col-block q feeds output col-block m iff q == m + dj.
            sel = jnp.eye(Wh, ow0, k=-dj, dtype=f32)                     # (Wh, ow0)
            taps.append(jnp.kron(sel, tap))                              # (Wh*4C, ow0*F0)
    conv_wbd.append(jnp.stack(taps, axis=0))                             # (4, Wh*4C, ow0*F0)
    conv_bias.append(jnp.tile(b0.astype(f32), ow0).reshape(1, ow0 * F0))
    conv_dims.append((oh0, ow0, F0))

    # ---- remaining convs: kernel 3, stride 1 ----
    in_f, in_oh, in_ow = F0, oh0, ow0
    for (w, b, s) in params["convs"][1:]:
        assert s == 1 and w.shape[2] == 3 and w.shape[3] == 3
        F = w.shape[0]
        oh, ow = in_oh - 2, in_ow - 2
        w = w.astype(f32)
        taps = []
        for ki in range(3):
            for kj in range(3):
                tap = jnp.transpose(w[:, :, ki, kj])                     # (in_f, F)
                sel = jnp.eye(in_ow, ow, k=-kj, dtype=f32)               # (in_ow, ow)
                taps.append(jnp.kron(sel, tap))                          # (in_ow*in_f, ow*F)
        conv_wbd.append(jnp.stack(taps, axis=0))                         # (9, ..., ow*F)
        conv_bias.append(jnp.tile(b.astype(f32), ow).reshape(1, ow * F))
        conv_dims.append((oh, ow, F))
        in_f, in_oh, in_ow = F, oh, ow

    # ---- fc: fold PyTorch's channel-major flatten into a row permutation of fc_w ----
    ohL, owL, fL = conv_dims[-1]
    feat = params["fc_w"].shape[1]
    fcw = (params["fc_w"].astype(f32)
           .reshape(fL, ohL, owL, feat)
           .transpose(1, 2, 0, 3)
           .reshape(ohL * owL * fL, feat))
    fcb = params["fc_b"].astype(f32).reshape(1, feat)
    ln_g = params["ln_g"].astype(f32).reshape(1, feat)
    ln_b = params["ln_b"].astype(f32).reshape(1, feat)

    # ---- regression MLP; zero-pad the final Linear(., 1) to a lane-dense width ----
    reg = [(w.astype(f32), b.astype(f32).reshape(1, -1)) for (w, b) in params["reg"]]
    w_last, b_last = reg[-1]
    out_dim = w_last.shape[1]
    out_pad = ((out_dim + 127) // 128) * 128
    if out_pad != out_dim:
        w_last = jnp.zeros((w_last.shape[0], out_pad), f32).at[:, :out_dim].set(w_last)
        b_last = jnp.zeros((1, out_pad), f32).at[:, :out_dim].set(b_last)
        reg[-1] = (w_last, b_last)

    meta = dict(C=C, H=H, W=W, Hh=Hh, Wh=Wh, s2d_c=s2d_c,
                conv_dims=tuple(conv_dims), out_dim=out_dim, out_pad=out_pad)
    return dict(conv_wbd=conv_wbd, conv_bias=conv_bias, fcw=fcw, fcb=fcb,
                ln_g=ln_g, ln_b=ln_b, reg=reg, meta=meta)


# ----------------------------------------------------------------------------
# Forward wrapper
# ----------------------------------------------------------------------------
def pallas_forward(obs_nchw, fused):
    meta = fused["meta"]
    B = obs_nchw.shape[0]
    C, Hh, Wh, s2d_c = meta["C"], meta["Hh"], meta["Wh"], meta["s2d_c"]
    conv_dims, out_dim, out_pad = meta["conv_dims"], meta["out_dim"], meta["out_pad"]

    # Space-to-depth: a pure permutation of the raw obs (no data duplication) that turns
    # the stride-2 first conv into unit-stride shift+matmul taps inside the kernel.
    x = obs_nchw.astype(jnp.float32)
    xs2d = (x.reshape(B, C, Hh, 2, Wh, 2)
             .transpose(0, 2, 4, 3, 5, 1)
             .reshape(B, Hh, Wh * s2d_c))

    inputs = [xs2d]
    in_specs = [pl.BlockSpec((1, Hh, Wh * s2d_c), lambda b: (b, 0, 0))]

    def const_spec(arr):
        # Constant block index across the batch grid -> stays resident in VMEM.
        if arr.ndim == 3:
            return pl.BlockSpec(arr.shape, lambda b: (0, 0, 0))
        return pl.BlockSpec(arr.shape, lambda b: (0, 0))

    for wbd, bias in zip(fused["conv_wbd"], fused["conv_bias"]):
        inputs += [wbd, bias]
        in_specs += [const_spec(wbd), const_spec(bias)]
    for arr in (fused["fcw"], fused["fcb"], fused["ln_g"], fused["ln_b"]):
        inputs.append(arr)
        in_specs.append(const_spec(arr))
    for w, b in fused["reg"]:
        inputs += [w, b]
        in_specs += [const_spec(w), const_spec(b)]

    # Rough cost estimate so XLA schedules sensibly around the custom call.
    flops = 0
    for wbd, (oh, ow, f) in zip(fused["conv_wbd"], conv_dims):
        flops += 2 * int(wbd.shape[0]) * oh * int(wbd.shape[1]) * int(wbd.shape[2])
    ohL, owL, fL = conv_dims[-1]
    feat = int(fused["fcw"].shape[1])
    flops += 2 * ohL * (owL * fL) * feat
    prev = feat
    for w, _ in fused["reg"]:
        flops += 2 * prev * int(w.shape[1])
        prev = int(w.shape[1])
    flops *= B
    bytes_accessed = 4 * (sum(int(a.size) for a in inputs) + B * out_pad)

    kernel = functools.partial(_fused_forward_kernel,
                               conv_dims=conv_dims, n_reg=len(fused["reg"]))

    out = pl.pallas_call(
        kernel,
        out_shape=jax.ShapeDtypeStruct((B, 1, out_pad), jnp.float32),
        grid=(B,),
        in_specs=in_specs,
        out_specs=pl.BlockSpec((1, 1, out_pad), lambda b: (b, 0, 0)),
        compiler_params=pltpu.CompilerParams(
            dimension_semantics=("parallel",),
            vmem_limit_bytes=64 * 1024 * 1024,
        ),
        cost_estimate=pl.CostEstimate(
            flops=flops, transcendentals=B, bytes_accessed=bytes_accessed),
    )(*inputs)
    return out[:, 0, :out_dim]


# ----------------------------------------------------------------------------
# Pure-JAX reference with PyTorch semantics (NCHW conv, channel-major flatten)
# ----------------------------------------------------------------------------
def reference_forward(obs_nchw, params):
    hp = jax.lax.Precision.HIGHEST
    x = obs_nchw.astype(jnp.float32) / 255.0
    for (w, b, stride) in params["convs"]:
        x = jax.lax.conv_general_dilated(
            x, w, (stride, stride), "VALID",
            dimension_numbers=("NCHW", "OIHW", "NCHW"), precision=hp)
        x = jnp.maximum(x + b[None, :, None, None], 0.0)
    h = x.reshape(x.shape[0], -1)
    z = jnp.dot(h, params["fc_w"], precision=hp) + params["fc_b"]
    mu = z.mean(-1, keepdims=True)
    var = ((z - mu) ** 2).mean(-1, keepdims=True)
    z = (z - mu) / jnp.sqrt(var + 1e-5) * params["ln_g"] + params["ln_b"]
    a = z
    for i, (w, b) in enumerate(params["reg"]):
        a = jnp.dot(a, w, precision=hp) + b
        if i < len(params["reg"]) - 1:
            a = jnp.maximum(a, 0.0)
    return a


# ----------------------------------------------------------------------------
# Deterministic parameter init (shapes per module __init__)
# ----------------------------------------------------------------------------
def init_params(key, obs_shape, num_layers, num_filters, feature_dim, dim_hidden):
    C, H, W = obs_shape

    def linear(key, fan_in, fan_out):
        k1, k2 = jax.random.split(key)
        bound = 1.0 / np.sqrt(fan_in)
        w = jax.random.uniform(k1, (fan_in, fan_out), jnp.float32, -bound, bound)
        b = jax.random.uniform(k2, (fan_out,), jnp.float32, -bound, bound)
        return w, b

    def conv(key, c_in, c_out, k):
        k1, k2 = jax.random.split(key)
        bound = 1.0 / np.sqrt(c_in * k * k)
        w = jax.random.uniform(k1, (c_out, c_in, k, k), jnp.float32, -bound, bound)
        b = jax.random.uniform(k2, (c_out,), jnp.float32, -bound, bound)
        return w, b

    keys = jax.random.split(key, num_layers + len(dim_hidden) + 3)
    ki = 0

    convs = []
    w, b = conv(keys[ki], C, num_filters, 3); ki += 1
    convs.append((w, b, 2))
    oh = (H - 3) // 2 + 1
    for _ in range(num_layers - 1):
        w, b = conv(keys[ki], num_filters, num_filters, 3); ki += 1
        convs.append((w, b, 1))
        oh = oh - 3 + 1

    flat_dim = num_filters * oh * oh
    fc_w, fc_b = linear(keys[ki], flat_dim, feature_dim); ki += 1
    ln_g = jnp.ones((feature_dim,), jnp.float32)
    ln_b = jnp.zeros((feature_dim,), jnp.float32)

    reg = []
    prev = feature_dim
    for h in dim_hidden:
        w, b = linear(keys[ki], prev, h); ki += 1
        reg.append((w, b))
        prev = h
    w, b = linear(keys[ki], prev, 1); ki += 1
    reg.append((w, b))

    return {
        "convs": convs,
        "fc_w": fc_w,
        "fc_b": fc_b,
        "ln_g": ln_g,
        "ln_b": ln_b,
        "reg": reg,
    }


# ----------------------------------------------------------------------------
if __name__ == "__main__":
    # Small config consistent with the module:
    #   obs_shape=(4, 16, 16), num_layers=2, num_filters=8,
    #   encoder_feature_dim=32, dim_hidden="32_32"
    B = 2
    obs_shape = (4, 16, 16)
    num_layers = 2
    num_filters = 8
    feature_dim = 32
    dim_hidden = [32, 32]

    key = jax.random.PRNGKey(0)
    k_params, k_obs = jax.random.split(key)
    params = init_params(k_params, obs_shape, num_layers, num_filters,
                         feature_dim, dim_hidden)

    # image-like input in [0, 255], NCHW
    obs = jax.random.uniform(k_obs, (B,) + obs_shape, jnp.float32, 0.0, 255.0)

    fused = prepare_fused_params(params, obs_shape)   # one-time weight prep
    out = pallas_forward(obs, fused)
    out = jax.block_until_ready(out)

    ref = reference_forward(obs, params)
    # f32 end-to-end; typically matches to ~1e-5, tolerance left with headroom.
    np.testing.assert_allclose(np.asarray(out), np.asarray(ref),
                               rtol=5e-3, atol=5e-3)
    assert out.shape == (B, 1)

    print("KERNEL_OK")
</pallas_src>

<mosaic_0001>
module attributes {stable_mosaic.version = 11 : i64} {
  func.func @_fused_forward_kernel(%arg0: i32, %arg1: memref<1x8x128xf32, #tpu.memory_space<vmem>>, %arg2: memref<4x128x56xf32, #tpu.memory_space<vmem>>, %arg3: memref<1x56xf32, #tpu.memory_space<vmem>>, %arg4: memref<9x56x40xf32, #tpu.memory_space<vmem>>, %arg5: memref<1x40xf32, #tpu.memory_space<vmem>>, %arg6: memref<200x32xf32, #tpu.memory_space<vmem>>, %arg7: memref<1x32xf32, #tpu.memory_space<vmem>>, %arg8: memref<1x32xf32, #tpu.memory_space<vmem>>, %arg9: memref<1x32xf32, #tpu.memory_space<vmem>>, %arg10: memref<32x32xf32, #tpu.memory_space<vmem>>, %arg11: memref<1x32xf32, #tpu.memory_space<vmem>>, %arg12: memref<32x32xf32, #tpu.memory_space<vmem>>, %arg13: memref<1x32xf32, #tpu.memory_space<vmem>>, %arg14: memref<32x128xf32, #tpu.memory_space<vmem>>, %arg15: memref<1x128xf32, #tpu.memory_space<vmem>>, %arg16: memref<1x1x128xf32, #tpu.memory_space<vmem>>) attributes {dimension_semantics = [#tpu.dimension_semantics<parallel>], iteration_bounds = array<i64: 2>, scalar_prefetch = 0 : i64, scratch_operands = 0 : i64, tpu.core_type = #tpu.core_type<tc>, window_params = [{transform_indices = @transform_0, window_bounds = array<i64: 1, 8, 128>}, {pipeline_mode = #tpu.pipeline_mode<synchronous>, transform_indices = @transform_1, window_bounds = array<i64: 4, 128, 56>}, {pipeline_mode = #tpu.pipeline_mode<synchronous>, transform_indices = @transform_2, window_bounds = array<i64: 1, 56>}, {pipeline_mode = #tpu.pipeline_mode<synchronous>, transform_indices = @transform_3, window_bounds = array<i64: 9, 56, 40>}, {pipeline_mode = #tpu.pipeline_mode<synchronous>, transform_indices = @transform_4, window_bounds = array<i64: 1, 40>}, {pipeline_mode = #tpu.pipeline_mode<synchronous>, transform_indices = @transform_5, window_bounds = array<i64: 200, 32>}, {pipeline_mode = #tpu.pipeline_mode<synchronous>, transform_indices = @transform_6, window_bounds = array<i64: 1, 32>}, {pipeline_mode = #tpu.pipeline_mode<synchronous>, transform_indices = @transform_7, window_bounds = array<i64: 1, 32>}, {pipeline_mode = #tpu.pipeline_mode<synchronous>, transform_indices = @transform_8, window_bounds = array<i64: 1, 32>}, {pipeline_mode = #tpu.pipeline_mode<synchronous>, transform_indices = @transform_9, window_bounds = array<i64: 32, 32>}, {pipeline_mode = #tpu.pipeline_mode<synchronous>, transform_indices = @transform_10, window_bounds = array<i64: 1, 32>}, {pipeline_mode = #tpu.pipeline_mode<synchronous>, transform_indices = @transform_11, window_bounds = array<i64: 32, 32>}, {pipeline_mode = #tpu.pipeline_mode<synchronous>, transform_indices = @transform_12, window_bounds = array<i64: 1, 32>}, {pipeline_mode = #tpu.pipeline_mode<synchronous>, transform_indices = @transform_13, window_bounds = array<i64: 32, 128>}, {pipeline_mode = #tpu.pipeline_mode<synchronous>, transform_indices = @transform_14, window_bounds = array<i64: 1, 128>}, {transform_indices = @transform_15, window_bounds = array<i64: 1, 1, 128>}]} {
    %c0 = arith.constant 0 : index
    %c0_0 = arith.constant 0 : index
    %c0_1 = arith.constant 0 : index
    %0 = vector.load %arg1[%c0, %c0_0, %c0_1] : memref<1x8x128xf32, #tpu.memory_space<vmem>>, vector<1x8x128xf32>
    %1 = vector.shape_cast %0 : vector<1x8x128xf32> to vector<8x128xf32>
    %cst = arith.constant 0.000000e+00 : f32
    %2 = vector.broadcast %cst : f32 to vector<7x56xf32>
    %3 = vector.extract_strided_slice %1 {offsets = [0, 0], sizes = [7, 128], strides = [1, 1]} : vector<8x128xf32> to vector<7x128xf32>
    %c0_2 = arith.constant 0 : index
    %c0_3 = arith.constant 0 : index
    %c0_4 = arith.constant 0 : index
    %4 = vector.load %arg2[%c0_2, %c0_3, %c0_4] : memref<4x128x56xf32, #tpu.memory_space<vmem>>, vector<1x128x56xf32>
    %5 = vector.shape_cast %4 : vector<1x128x56xf32> to vector<128x56xf32>
    %cst_5 = arith.constant dense<0.000000e+00> : vector<7x56xf32>
    %6 = tpu.matmul %3, %5, %cst_5 {dimension_numbers = #tpu.dot_dimension_numbers<[1], [0], [0], [1], [0, 0, 1, 1], [], []>} : vector<7x128xf32>, vector<128x56xf32>, vector<7x56xf32> -> vector<7x56xf32>
    %7 = arith.addf %2, %6 : vector<7x56xf32>
    %8 = vector.extract_strided_slice %1 {offsets = [0, 0], sizes = [7, 128], strides = [1, 1]} : vector<8x128xf32> to vector<7x128xf32>
    %c1 = arith.constant 1 : index
    %c0_6 = arith.constant 0 : index
    %c0_7 = arith.constant 0 : index
    %9 = vector.load %arg2[%c1, %c0_6, %c0_7] : memref<4x128x56xf32, #tpu.memory_space<vmem>>, vector<1x128x56xf32>
    %10 = vector.shape_cast %9 : vector<1x128x56xf32> to vector<128x56xf32>
    %cst_8 = arith.constant dense<0.000000e+00> : vector<7x56xf32>
    %11 = tpu.matmul %8, %10, %cst_8 {dimension_numbers = #tpu.dot_dimension_numbers<[1], [0], [0], [1], [0, 0, 1, 1], [], []>} : vector<7x128xf32>, vector<128x56xf32>, vector<7x56xf32> -> vector<7x56xf32>
    %12 = arith.addf %7, %11 : vector<7x56xf32>
    %13 = vector.extract_strided_slice %1 {offsets = [1, 0], sizes = [7, 128], strides = [1, 1]} : vector<8x128xf32> to vector<7x128xf32>
    %c2 = arith.constant 2 : index
    %c0_9 = arith.constant 0 : index
    %c0_10 = arith.constant 0 : index
    %14 = vector.load %arg2[%c2, %c0_9, %c0_10] : memref<4x128x56xf32, #tpu.memory_space<vmem>>, vector<1x128x56xf32>
    %15 = vector.shape_cast %14 : vector<1x128x56xf32> to vector<128x56xf32>
    %cst_11 = arith.constant dense<0.000000e+00> : vector<7x56xf32>
    %16 = tpu.matmul %13, %15, %cst_11 {dimension_numbers = #tpu.dot_dimension_numbers<[1], [0], [0], [1], [0, 0, 1, 1], [], []>} : vector<7x128xf32>, vector<128x56xf32>, vector<7x56xf32> -> vector<7x56xf32>
    %17 = arith.addf %12, %16 : vector<7x56xf32>
    %18 = vector.extract_strided_slice %1 {offsets = [1, 0], sizes = [7, 128], strides = [1, 1]} : vector<8x128xf32> to vector<7x128xf32>
    %c3 = arith.constant 3 : index
    %c0_12 = arith.constant 0 : index
    %c0_13 = arith.constant 0 : index
    %19 = vector.load %arg2[%c3, %c0_12, %c0_13] : memref<4x128x56xf32, #tpu.memory_space<vmem>>, vector<1x128x56xf32>
    %20 = vector.shape_cast %19 : vector<1x128x56xf32> to vector<128x56xf32>
    %cst_14 = arith.constant dense<0.000000e+00> : vector<7x56xf32>
    %21 = tpu.matmul %18, %20, %cst_14 {dimension_numbers = #tpu.dot_dimension_numbers<[1], [0], [0], [1], [0, 0, 1, 1], [], []>} : vector<7x128xf32>, vector<128x56xf32>, vector<7x56xf32> -> vector<7x56xf32>
    %22 = arith.addf %17, %21 : vector<7x56xf32>
    %c0_15 = arith.constant 0 : index
    %c0_16 = arith.constant 0 : index
    %23 = vector.load %arg3[%c0_15, %c0_16] : memref<1x56xf32, #tpu.memory_space<vmem>>, vector<1x56xf32>
    %24 = vector.broadcast %23 : vector<1x56xf32> to vector<7x56xf32>
    %25 = arith.addf %22, %24 : vector<7x56xf32>
    %cst_17 = arith.constant 0.000000e+00 : f32
    %26 = vector.broadcast %cst_17 : f32 to vector<7x56xf32>
    %27 = arith.maximumf %25, %26 : vector<7x56xf32>
    %cst_18 = arith.constant 0.000000e+00 : f32
    %28 = vector.broadcast %cst_18 : f32 to vector<5x40xf32>
    %29 = vector.extract_strided_slice %27 {offsets = [0, 0], sizes = [5, 56], strides = [1, 1]} : vector<7x56xf32> to vector<5x56xf32>
    %c0_19 = arith.constant 0 : index
    %c0_20 = arith.constant 0 : index
    %c0_21 = arith.constant 0 : index
    %30 = vector.load %arg4[%c0_19, %c0_20, %c0_21] : memref<9x56x40xf32, #tpu.memory_space<vmem>>, vector<1x56x40xf32>
    %31 = vector.shape_cast %30 : vector<1x56x40xf32> to vector<56x40xf32>
    %cst_22 = arith.constant dense<0.000000e+00> : vector<5x40xf32>
    %32 = tpu.matmul %29, %31, %cst_22 {dimension_numbers = #tpu.dot_dimension_numbers<[1], [0], [0], [1], [0, 0, 1, 1], [], []>} : vector<5x56xf32>, vector<56x40xf32>, vector<5x40xf32> -> vector<5x40xf32>
    %33 = arith.addf %28, %32 : vector<5x40xf32>
    %34 = vector.extract_strided_slice %27 {offsets = [0, 0], sizes = [5, 56], strides = [1, 1]} : vector<7x56xf32> to vector<5x56xf32>
    %c1_23 = arith.constant 1 : index
    %c0_24 = arith.constant 0 : index
    %c0_25 = arith.constant 0 : index
    %35 = vector.load %arg4[%c1_23, %c0_24, %c0_25] : memref<9x56x40xf32, #tpu.memory_space<vmem>>, vector<1x56x40xf32>
    %36 = vector.shape_cast %35 : vector<1x56x40xf32> to vector<56x40xf32>
    %cst_26 = arith.constant dense<0.000000e+00> : vector<5x40xf32>
    %37 = tpu.matmul %34, %36, %cst_26 {dimension_numbers = #tpu.dot_dimension_numbers<[1], [0], [0], [1], [0, 0, 1, 1], [], []>} : vector<5x56xf32>, vector<56x40xf32>, vector<5x40xf32> -> vector<5x40xf32>
    %38 = arith.addf %33, %37 : vector<5x40xf32>
    %39 = vector.extract_strided_slice %27 {offsets = [0, 0], sizes = [5, 56], strides = [1, 1]} : vector<7x56xf32> to vector<5x56xf32>
    %c2_27 = arith.constant 2 : index
    %c0_28 = arith.constant 0 : index
    %c0_29 = arith.constant 0 : index
    %40 = vector.load %arg4[%c2_27, %c0_28, %c0_29] : memref<9x56x40xf32, #tpu.memory_space<vmem>>, vector<1x56x40xf32>
    %41 = vector.shape_cast %40 : vector<1x56x40xf32> to vector<56x40xf32>
    %cst_30 = arith.constant dense<0.000000e+00> : vector<5x40xf32>
    %42 = tpu.matmul %39, %41, %cst_30 {dimension_numbers = #tpu.dot_dimension_numbers<[1], [0], [0], [1], [0, 0, 1, 1], [], []>} : vector<5x56xf32>, vector<56x40xf32>, vector<5x40xf32> -> vector<5x40xf32>
    %43 = arith.addf %38, %42 : vector<5x40xf32>
    %44 = vector.extract_strided_slice %27 {offsets = [1, 0], sizes = [5, 56], strides = [1, 1]} : vector<7x56xf32> to vector<5x56xf32>
    %c3_31 = arith.constant 3 : index
    %c0_32 = arith.constant 0 : index
    %c0_33 = arith.constant 0 : index
    %45 = vector.load %arg4[%c3_31, %c0_32, %c0_33] : memref<9x56x40xf32, #tpu.memory_space<vmem>>, vector<1x56x40xf32>
    %46 = vector.shape_cast %45 : vector<1x56x40xf32> to vector<56x40xf32>
    %cst_34 = arith.constant dense<0.000000e+00> : vector<5x40xf32>
    %47 = tpu.matmul %44, %46, %cst_34 {dimension_numbers = #tpu.dot_dimension_numbers<[1], [0], [0], [1], [0, 0, 1, 1], [], []>} : vector<5x56xf32>, vector<56x40xf32>, vector<5x40xf32> -> vector<5x40xf32>
    %48 = arith.addf %43, %47 : vector<5x40xf32>
    %49 = vector.extract_strided_slice %27 {offsets = [1, 0], sizes = [5, 56], strides = [1, 1]} : vector<7x56xf32> to vector<5x56xf32>
    %c4 = arith.constant 4 : index
    %c0_35 = arith.constant 0 : index
    %c0_36 = arith.constant 0 : index
    %50 = vector.load %arg4[%c4, %c0_35, %c0_36] : memref<9x56x40xf32, #tpu.memory_space<vmem>>, vector<1x56x40xf32>
    %51 = vector.shape_cast %50 : vector<1x56x40xf32> to vector<56x40xf32>
    %cst_37 = arith.constant dense<0.000000e+00> : vector<5x40xf32>
    %52 = tpu.matmul %49, %51, %cst_37 {dimension_numbers = #tpu.dot_dimension_numbers<[1], [0], [0], [1], [0, 0, 1, 1], [], []>} : vector<5x56xf32>, vector<56x40xf32>, vector<5x40xf32> -> vector<5x40xf32>
    %53 = arith.addf %48, %52 : vector<5x40xf32>
    %54 = vector.extract_strided_slice %27 {offsets = [1, 0], sizes = [5, 56], strides = [1, 1]} : vector<7x56xf32> to vector<5x56xf32>
    %c5 = arith.constant 5 : index
    %c0_38 = arith.constant 0 : index
    %c0_39 = arith.constant 0 : index
    %55 = vector.load %arg4[%c5, %c0_38, %c0_39] : memref<9x56x40xf32, #tpu.memory_space<vmem>>, vector<1x56x40xf32>
    %56 = vector.shape_cast %55 : vector<1x56x40xf32> to vector<56x40xf32>
    %cst_40 = arith.constant dense<0.000000e+00> : vector<5x40xf32>
    %57 = tpu.matmul %54, %56, %cst_40 {dimension_numbers = #tpu.dot_dimension_numbers<[1], [0], [0], [1], [0, 0, 1, 1], [], []>} : vector<5x56xf32>, vector<56x40xf32>, vector<5x40xf32> -> vector<5x40xf32>
    %58 = arith.addf %53, %57 : vector<5x40xf32>
    %59 = vector.extract_strided_slice %27 {offsets = [2, 0], sizes = [5, 56], strides = [1, 1]} : vector<7x56xf32> to vector<5x56xf32>
    %c6 = arith.constant 6 : index
    %c0_41 = arith.constant 0 : index
    %c0_42 = arith.constant 0 : index
    %60 = vector.load %arg4[%c6, %c0_41, %c0_42] : memref<9x56x40xf32, #tpu.memory_space<vmem>>, vector<1x56x40xf32>
    %61 = vector.shape_cast %60 : vector<1x56x40xf32> to vector<56x40xf32>
    %cst_43 = arith.constant dense<0.000000e+00> : vector<5x40xf32>
    %62 = tpu.matmul %59, %61, %cst_43 {dimension_numbers = #tpu.dot_dimension_numbers<[1], [0], [0], [1], [0, 0, 1, 1], [], []>} : vector<5x56xf32>, vector<56x40xf32>, vector<5x40xf32> -> vector<5x40xf32>
    %63 = arith.addf %58, %62 : vector<5x40xf32>
    %64 = vector.extract_strided_slice %27 {offsets = [2, 0], sizes = [5, 56], strides = [1, 1]} : vector<7x56xf32> to vector<5x56xf32>
    %c7 = arith.constant 7 : index
    %c0_44 = arith.constant 0 : index
    %c0_45 = arith.constant 0 : index
    %65 = vector.load %arg4[%c7, %c0_44, %c0_45] : memref<9x56x40xf32, #tpu.memory_space<vmem>>, vector<1x56x40xf32>
    %66 = vector.shape_cast %65 : vector<1x56x40xf32> to vector<56x40xf32>
    %cst_46 = arith.constant dense<0.000000e+00> : vector<5x40xf32>
    %67 = tpu.matmul %64, %66, %cst_46 {dimension_numbers = #tpu.dot_dimension_numbers<[1], [0], [0], [1], [0, 0, 1, 1], [], []>} : vector<5x56xf32>, vector<56x40xf32>, vector<5x40xf32> -> vector<5x40xf32>
    %68 = arith.addf %63, %67 : vector<5x40xf32>
    %69 = vector.extract_strided_slice %27 {offsets = [2, 0], sizes = [5, 56], strides = [1, 1]} : vector<7x56xf32> to vector<5x56xf32>
    %c8 = arith.constant 8 : index
    %c0_47 = arith.constant 0 : index
    %c0_48 = arith.constant 0 : index
    %70 = vector.load %arg4[%c8, %c0_47, %c0_48] : memref<9x56x40xf32, #tpu.memory_space<vmem>>, vector<1x56x40xf32>
    %71 = vector.shape_cast %70 : vector<1x56x40xf32> to vector<56x40xf32>
    %cst_49 = arith.constant dense<0.000000e+00> : vector<5x40xf32>
    %72 = tpu.matmul %69, %71, %cst_49 {dimension_numbers = #tpu.dot_dimension_numbers<[1], [0], [0], [1], [0, 0, 1, 1], [], []>} : vector<5x56xf32>, vector<56x40xf32>, vector<5x40xf32> -> vector<5x40xf32>
    %73 = arith.addf %68, %72 : vector<5x40xf32>
    %c0_50 = arith.constant 0 : index
    %c0_51 = arith.constant 0 : index
    %74 = vector.load %arg5[%c0_50, %c0_51] : memref<1x40xf32, #tpu.memory_space<vmem>>, vector<1x40xf32>
    %75 = vector.broadcast %74 : vector<1x40xf32> to vector<5x40xf32>
    %76 = arith.addf %73, %75 : vector<5x40xf32>
    %cst_52 = arith.constant 0.000000e+00 : f32
    %77 = vector.broadcast %cst_52 : f32 to vector<5x40xf32>
    %78 = arith.maximumf %76, %77 : vector<5x40xf32>
    %c0_53 = arith.constant 0 : index
    %c0_54 = arith.constant 0 : index
    %79 = vector.load %arg6[%c0_53, %c0_54] : memref<200x32xf32, #tpu.memory_space<vmem>>, vector<200x32xf32>
    %c0_55 = arith.constant 0 : index
    %c0_56 = arith.constant 0 : index
    %80 = vector.load %arg7[%c0_55, %c0_56] : memref<1x32xf32, #tpu.memory_space<vmem>>, vector<1x32xf32>
    %81 = vector.extract_strided_slice %78 {offsets = [0, 0], sizes = [1, 40], strides = [1, 1]} : vector<5x40xf32> to vector<1x40xf32>
    %82 = vector.extract_strided_slice %79 {offsets = [0, 0], sizes = [40, 32], strides = [1, 1]} : vector<200x32xf32> to vector<40x32xf32>
    %cst_57 = arith.constant dense<0.000000e+00> : vector<1x32xf32>
    %83 = tpu.matmul %81, %82, %cst_57 {dimension_numbers = #tpu.dot_dimension_numbers<[1], [0], [0], [1], [0, 0, 1, 1], [], []>} : vector<1x40xf32>, vector<40x32xf32>, vector<1x32xf32> -> vector<1x32xf32>
    %84 = arith.addf %80, %83 : vector<1x32xf32>
    %85 = vector.extract_strided_slice %78 {offsets = [1, 0], sizes = [1, 40], strides = [1, 1]} : vector<5x40xf32> to vector<1x40xf32>
    %86 = vector.extract_strided_slice %79 {offsets = [40, 0], sizes = [40, 32], strides = [1, 1]} : vector<200x32xf32> to vector<40x32xf32>
    %cst_58 = arith.constant dense<0.000000e+00> : vector<1x32xf32>
    %87 = tpu.matmul %85, %86, %cst_58 {dimension_numbers = #tpu.dot_dimension_numbers<[1], [0], [0], [1], [0, 0, 1, 1], [], []>} : vector<1x40xf32>, vector<40x32xf32>, vector<1x32xf32> -> vector<1x32xf32>
    %88 = arith.addf %84, %87 : vector<1x32xf32>
    %89 = vector.extract_strided_slice %78 {offsets = [2, 0], sizes = [1, 40], strides = [1, 1]} : vector<5x40xf32> to vector<1x40xf32>
    %90 = vector.extract_strided_slice %79 {offsets = [80, 0], sizes = [40, 32], strides = [1, 1]} : vector<200x32xf32> to vector<40x32xf32>
    %cst_59 = arith.constant dense<0.000000e+00> : vector<1x32xf32>
    %91 = tpu.matmul %89, %90, %cst_59 {dimension_numbers = #tpu.dot_dimension_numbers<[1], [0], [0], [1], [0, 0, 1, 1], [], []>} : vector<1x40xf32>, vector<40x32xf32>, vector<1x32xf32> -> vector<1x32xf32>
    %92 = arith.addf %88, %91 : vector<1x32xf32>
    %93 = vector.extract_strided_slice %78 {offsets = [3, 0], sizes = [1, 40], strides = [1, 1]} : vector<5x40xf32> to vector<1x40xf32>
    %94 = vector.extract_strided_slice %79 {offsets = [120, 0], sizes = [40, 32], strides = [1, 1]} : vector<200x32xf32> to vector<40x32xf32>
    %cst_60 = arith.constant dense<0.000000e+00> : vector<1x32xf32>
    %95 = tpu.matmul %93, %94, %cst_60 {dimension_numbers = #tpu.dot_dimension_numbers<[1], [0], [0], [1], [0, 0, 1, 1], [], []>} : vector<1x40xf32>, vector<40x32xf32>, vector<1x32xf32> -> vector<1x32xf32>
    %96 = arith.addf %92, %95 : vector<1x32xf32>
    %97 = vector.extract_strided_slice %78 {offsets = [4, 0], sizes = [1, 40], strides = [1, 1]} : vector<5x40xf32> to vector<1x40xf32>
    %98 = vector.extract_strided_slice %79 {offsets = [160, 0], sizes = [40, 32], strides = [1, 1]} : vector<200x32xf32> to vector<40x32xf32>
    %cst_61 = arith.constant dense<0.000000e+00> : vector<1x32xf32>
    %99 = tpu.matmul %97, %98, %cst_61 {dimension_numbers = #tpu.dot_dimension_numbers<[1], [0], [0], [1], [0, 0, 1, 1], [], []>} : vector<1x40xf32>, vector<40x32xf32>, vector<1x32xf32> -> vector<1x32xf32>
    %100 = arith.addf %96, %99 : vector<1x32xf32>
    %cst_62 = arith.constant dense<0.000000e+00> : vector<1xf32>
    %101 = vector.multi_reduction <add>, %100, %cst_62 [1] : vector<1x32xf32> to vector<1xf32>
    %102 = vector.shape_cast %101 : vector<1xf32> to vector<1x1xf32>
    %cst_63 = arith.constant 3.200000e+01 : f32
    %103 = vector.broadcast %cst_63 : f32 to vector<1x1xf32>
    %104 = arith.divf %102, %103 : vector<1x1xf32>
    %105 = vector.broadcast %104 : vector<1x1xf32> to vector<1x32xf32>
    %106 = arith.subf %100, %105 : vector<1x32xf32>
    %107 = arith.mulf %106, %106 : vector<1x32xf32>
    %cst_64 = arith.constant dense<0.000000e+00> : vector<1xf32>
    %108 = vector.multi_reduction <add>, %107, %cst_64 [1] : vector<1x32xf32> to vector<1xf32>
    %109 = vector.shape_cast %108 : vector<1xf32> to vector<1x1xf32>
    %cst_65 = arith.constant 3.200000e+01 : f32
    %110 = vector.broadcast %cst_65 : f32 to vector<1x1xf32>
    %111 = arith.divf %109, %110 : vector<1x1xf32>
    %cst_66 = arith.constant 9.99999974E-6 : f32
    %112 = vector.broadcast %cst_66 : f32 to vector<1x1xf32>
    %113 = arith.addf %111, %112 : vector<1x1xf32>
    %114 = math.rsqrt %113 : vector<1x1xf32>
    %115 = vector.broadcast %114 : vector<1x1xf32> to vector<1x32xf32>
    %116 = arith.mulf %106, %115 : vector<1x32xf32>
    %c0_67 = arith.constant 0 : index
    %c0_68 = arith.constant 0 : index
    %117 = vector.load %arg8[%c0_67, %c0_68] : memref<1x32xf32, #tpu.memory_space<vmem>>, vector<1x32xf32>
    %118 = arith.mulf %116, %117 : vector<1x32xf32>
    %c0_69 = arith.constant 0 : index
    %c0_70 = arith.constant 0 : index
    %119 = vector.load %arg9[%c0_69, %c0_70] : memref<1x32xf32, #tpu.memory_space<vmem>>, vector<1x32xf32>
    %120 = arith.addf %118, %119 : vector<1x32xf32>
    %c0_71 = arith.constant 0 : index
    %c0_72 = arith.constant 0 : index
    %121 = vector.load %arg10[%c0_71, %c0_72] : memref<32x32xf32, #tpu.memory_space<vmem>>, vector<32x32xf32>
    %cst_73 = arith.constant dense<0.000000e+00> : vector<1x32xf32>
    %122 = tpu.matmul %120, %121, %cst_73 {dimension_numbers = #tpu.dot_dimension_numbers<[1], [0], [0], [1], [0, 0, 1, 1], [], []>} : vector<1x32xf32>, vector<32x32xf32>, vector<1x32xf32> -> vector<1x32xf32>
    %c0_74 = arith.constant 0 : index
    %c0_75 = arith.constant 0 : index
    %123 = vector.load %arg11[%c0_74, %c0_75] : memref<1x32xf32, #tpu.memory_space<vmem>>, vector<1x32xf32>
    %124 = arith.addf %122, %123 : vector<1x32xf32>
    %cst_76 = arith.constant 0.000000e+00 : f32
    %125 = vector.broadcast %cst_76 : f32 to vector<1x32xf32>
    %126 = arith.maximumf %124, %125 : vector<1x32xf32>
    %c0_77 = arith.constant 0 : index
    %c0_78 = arith.constant 0 : index
    %127 = vector.load %arg12[%c0_77, %c0_78] : memref<32x32xf32, #tpu.memory_space<vmem>>, vector<32x32xf32>
    %cst_79 = arith.constant dense<0.000000e+00> : vector<1x32xf32>
    %128 = tpu.matmul %126, %127, %cst_79 {dimension_numbers = #tpu.dot_dimension_numbers<[1], [0], [0], [1], [0, 0, 1, 1], [], []>} : vector<1x32xf32>, vector<32x32xf32>, vector<1x32xf32> -> vector<1x32xf32>
    %c0_80 = arith.constant 0 : index
    %c0_81 = arith.constant 0 : index
    %129 = vector.load %arg13[%c0_80, %c0_81] : memref<1x32xf32, #tpu.memory_space<vmem>>, vector<1x32xf32>
    %130 = arith.addf %128, %129 : vector<1x32xf32>
    %cst_82 = arith.constant 0.000000e+00 : f32
    %131 = vector.broadcast %cst_82 : f32 to vector<1x32xf32>
    %132 = arith.maximumf %130, %131 : vector<1x32xf32>
    %c0_83 = arith.constant 0 : index
    %c0_84 = arith.constant 0 : index
    %133 = vector.load %arg14[%c0_83, %c0_84] : memref<32x128xf32, #tpu.memory_space<vmem>>, vector<32x128xf32>
    %cst_85 = arith.constant dense<0.000000e+00> : vector<1x128xf32>
    %134 = tpu.matmul %132, %133, %cst_85 {dimension_numbers = #tpu.dot_dimension_numbers<[1], [0], [0], [1], [0, 0, 1, 1], [], []>} : vector<1x32xf32>, vector<32x128xf32>, vector<1x128xf32> -> vector<1x128xf32>
    %c0_86 = arith.constant 0 : index
    %c0_87 = arith.constant 0 : index
    %135 = vector.load %arg15[%c0_86, %c0_87] : memref<1x128xf32, #tpu.memory_space<vmem>>, vector<1x128xf32>
    %136 = arith.addf %134, %135 : vector<1x128xf32>
    %c0_88 = arith.constant 0 : index
    %c0_89 = arith.constant 0 : index
    %c0_90 = arith.constant 0 : index
    %137 = vector.load %arg16[%c0_88, %c0_89, %c0_90] : memref<1x1x128xf32, #tpu.memory_space<vmem>>, vector<1x1x128xf32>
    %138 = vector.shape_cast %137 : vector<1x1x128xf32> to vector<1x128xf32>
    %139 = vector.shape_cast %136 : vector<1x128xf32> to vector<1x1x128xf32>
    tpu.vector_store %arg16[%c0_88, %c0_89, %c0_90], %139 {strides = array<i32>} : memref<1x1x128xf32, #tpu.memory_space<vmem>>, vector<1x1x128xf32>,
    return
  }
  func.func @transform_0(%arg0: i32) -> (i32, i32, i32) {
    %c0_i32 = arith.constant 0 : i32
    %c0_i32_0 = arith.constant 0 : i32
    %c0_i32_1 = arith.constant 0 : i32
    return %arg0, %c0_i32, %c0_i32_0 : i32, i32, i32
  }
  func.func @transform_1(%arg0: i32) -> (i32, i32, i32) {
    %c0_i32 = arith.constant 0 : i32
    %c0_i32_0 = arith.constant 0 : i32
    %c0_i32_1 = arith.constant 0 : i32
    %c0_i32_2 = arith.constant 0 : i32
    return %c0_i32, %c0_i32_0, %c0_i32_1 : i32, i32, i32
  }
  func.func @transform_2(%arg0: i32) -> (i32, i32) {
    %c0_i32 = arith.constant 0 : i32
    %c0_i32_0 = arith.constant 0 : i32
    %c0_i32_1 = arith.constant 0 : i32
    return %c0_i32, %c0_i32_0 : i32, i32
  }
  func.func @transform_3(%arg0: i32) -> (i32, i32, i32) {
    %c0_i32 = arith.constant 0 : i32
    %c0_i32_0 = arith.constant 0 : i32
    %c0_i32_1 = arith.constant 0 : i32
    %c0_i32_2 = arith.constant 0 : i32
    return %c0_i32, %c0_i32_0, %c0_i32_1 : i32, i32, i32
  }
  func.func @transform_4(%arg0: i32) -> (i32, i32) {
    %c0_i32 = arith.constant 0 : i32
    %c0_i32_0 = arith.constant 0 : i32
    %c0_i32_1 = arith.constant 0 : i32
    return %c0_i32, %c0_i32_0 : i32, i32
  }
  func.func @transform_5(%arg0: i32) -> (i32, i32) {
    %c0_i32 = arith.constant 0 : i32
    %c0_i32_0 = arith.constant 0 : i32
    %c0_i32_1 = arith.constant 0 : i32
    return %c0_i32, %c0_i32_0 : i32, i32
  }
  func.func @transform_6(%arg0: i32) -> (i32, i32) {
    %c0_i32 = arith.constant 0 : i32
    %c0_i32_0 = arith.constant 0 : i32
    %c0_i32_1 = arith.constant 0 : i32
    return %c0_i32, %c0_i32_0 : i32, i32
  }
  func.func @transform_7(%arg0: i32) -> (i32, i32) {
    %c0_i32 = arith.constant 0 : i32
    %c0_i32_0 = arith.constant 0 : i32
    %c0_i32_1 = arith.constant 0 : i32
    return %c0_i32, %c0_i32_0 : i32, i32
  }
  func.func @transform_8(%arg0: i32) -> (i32, i32) {
    %c0_i32 = arith.constant 0 : i32
    %c0_i32_0 = arith.constant 0 : i32
    %c0_i32_1 = arith.constant 0 : i32
    return %c0_i32, %c0_i32_0 : i32, i32
  }
  func.func @transform_9(%arg0: i32) -> (i32, i32) {
    %c0_i32 = arith.constant 0 : i32
    %c0_i32_0 = arith.constant 0 : i32
    %c0_i32_1 = arith.constant 0 : i32
    return %c0_i32, %c0_i32_0 : i32, i32
  }
  func.func @transform_10(%arg0: i32) -> (i32, i32) {
    %c0_i32 = arith.constant 0 : i32
    %c0_i32_0 = arith.constant 0 : i32
    %c0_i32_1 = arith.constant 0 : i32
    return %c0_i32, %c0_i32_0 : i32, i32
  }
  func.func @transform_11(%arg0: i32) -> (i32, i32) {
    %c0_i32 = arith.constant 0 : i32
    %c0_i32_0 = arith.constant 0 : i32
    %c0_i32_1 = arith.constant 0 : i32
    return %c0_i32, %c0_i32_0 : i32, i32
  }
  func.func @transform_12(%arg0: i32) -> (i32, i32) {
    %c0_i32 = arith.constant 0 : i32
    %c0_i32_0 = arith.constant 0 : i32
    %c0_i32_1 = arith.constant 0 : i32
    return %c0_i32, %c0_i32_0 : i32, i32
  }
  func.func @transform_13(%arg0: i32) -> (i32, i32) {
    %c0_i32 = arith.constant 0 : i32
    %c0_i32_0 = arith.constant 0 : i32
    %c0_i32_1 = arith.constant 0 : i32
    return %c0_i32, %c0_i32_0 : i32, i32
  }
  func.func @transform_14(%arg0: i32) -> (i32, i32) {
    %c0_i32 = arith.constant 0 : i32
    %c0_i32_0 = arith.constant 0 : i32
    %c0_i32_1 = arith.constant 0 : i32
    return %c0_i32, %c0_i32_0 : i32, i32
  }
  func.func @transform_15(%arg0: i32) -> (i32, i32, i32) {
    %c0_i32 = arith.constant 0 : i32
    %c0_i32_0 = arith.constant 0 : i32
    %c0_i32_1 = arith.constant 0 : i32
    return %arg0, %c0_i32, %c0_i32_0 : i32, i32, i32
  }
}

</mosaic_0001>

<bundles_post_ra>
// kernel: tpu_custom_call.1
= control target key start
LH: loop header
LB: loop body
LE: loop exit
PB: predicated region body
PF: predicated region fallthrough
CT: control target
= control target key end

     0   :  { %s4992_s0 = inlined_call_operand.hbm [shape: f32[2,8,128], index: 0, kind: input, shape index: {}]   ;;  %s4993_s1 = inlined_call_operand.hbm [shape: f32[4,128,56], index: 1, kind: input, shape index: {}]   ;;  %s4994_s2 = inlined_call_operand.hbm [shape: f32[1,56], index: 2, kind: input, shape index: {}]   ;;  %s4995_s3 = inlined_call_operand.hbm [shape: f32[9,56,40], index: 3, kind: input, shape index: {}]   ;;  %s4996_s4 = inlined_call_operand.hbm [shape: f32[1,40], index: 4, kind: input, shape index: {}]   ;;  %s4997_s5 = inlined_call_operand.hbm [shape: f32[200,32], index: 5, kind: input, shape index: {}]   ;;  %s4998_s6 = inlined_call_operand.hbm [shape: f32[1,32], index: 6, kind: input, shape index: {}]   ;;  %s4999_s7 = inlined_call_operand.hbm [shape: f32[1,32], index: 7, kind: input, shape index: {}]   ;;  %s5000_s8 = inlined_call_operand.hbm [shape: f32[1,32], index: 8, kind: input, shape index: {}]   ;;  %s5001_s9 = inlined_call_operand.hbm [shape: f32[32,32], index: 9, kind: input, shape index: {}]   ;;  %s5002_s10 = inlined_call_operand.hbm [shape: f32[1,32], index: 10, kind: input, shape index: {}]   ;;  %s5003_s11 = inlined_call_operand.hbm [shape: f32[32,32], index: 11, kind: input, shape index: {}]   ;;  %s5004_s12 = inlined_call_operand.hbm [shape: f32[1,32], index: 12, kind: input, shape index: {}]   ;;  %s5005_s13 = inlined_call_operand.hbm [shape: f32[32,128], index: 13, kind: input, shape index: {}]   ;;  %s5006_s14 = inlined_call_operand.hbm [shape: f32[1,128], index: 14, kind: input, shape index: {}]   ;;  %s5007_s15 = inlined_call_operand.hbm [shape: f32[2,1,128], index: 15, kind: output, shape index: {}]  }
   0x1   :  { %5019 = sst [smem:[#allocation41_spill]] %s4992_s0 }
   0x2   :  { %5020 = sst [smem:[#allocation42_spill]] %s4993_s1 }
   0x3   :  { %5021 = sst [smem:[#allocation43_spill]] %s4994_s2 }
   0x4   :  { %5022 = sst [smem:[#allocation44_spill]] %s5007_s15 }
   0x5   :  { %20 = vsyncpa [#allocation3], 0 }
   0x6   :  { %22 = vsyncpa [#allocation3 + $0x1], 0 }
   0x7   :  { %23 = vsyncpa [#allocation6], 0 }
   0x8   :  { %24 = vsyncpa [#allocation9], 0 }
   0x9   :  { %25 = vsyncpa [#allocation12], 0 }
   0xa   :  { %26 = vsyncpa [#allocation15], 0 }
   0xb   :  { %27 = vsyncpa [#allocation18], 0 }
   0xc   :  { %28 = vsyncpa [#allocation21], 0 }
   0xd   :  { %29 = vsyncpa [#allocation24], 0 }
   0xe   :  { %30 = vsyncpa [#allocation4], 0 }
   0xf   :  { %32 = vsyncpa [#allocation4 + $0x1], 0  ;;  %s4330_s18 = smov 0   ;;  %s4332_s19 = smov 0  }
  0x10   :  { %s4334_s20 = smov 0   ;;  %s4336_s21 = smov 0  }
  0x11 LB: > { %5023 = sst [smem:[#allocation36_spill]] %s4215_s18  ;;  %s4229_s22 = smov [#allocation5]   ;;  %s4227_s21 = sphi %s4336_s21, %s5070_s21   ;;  %s4223_s20 = sphi %s4334_s20, %s5069_s20   ;;  %s4219_s19 = sphi %s4332_s19, %s5068_s19   ;;  %s4215_s18 = sphi %s4330_s18, %s5067_s18  }
  0x12   : > { %5024 = sst [smem:[#allocation37_spill]] %s4219_s19  ;;  %s401_s23 = sshll.u32 %s4229_s22, 4  ;;  %s4356_s23 = int_to_ptr.vmem [resolvable:$true] %s401_s23 }
  0x13   : > { %5025 = sst [smem:[#allocation38_spill]] %s4223_s20  ;;  %s4351_s24 = sadd.s32 4294967295, %s4227_s21  }
  0x14   : > { %5026 = sst [smem:[#allocation39_spill]] %s4351_s24  ;;  %p2652_p0 = scmp.ge.s32.totalorder %s4227_s21, 1 }
  0x15   : > { %p5016_p1 = scmp.eq.s32.totalorder %s4351_s24, 0  ;;  %p389_p2 = scmp.lt.s32.totalorder %s4227_s21, 3 }
  0x16   : > { %s4230_s26 = smov [#allocation8]   ;;  %s4231_s29 = smov [#allocation11]  }
  0x17   : > { %p4358_p3 = pnand %p2652_p0, %p389_p2  ;;  %s425_s27 = sshll.u32 %s4230_s26, 4  ;;  %s4371_s27 = int_to_ptr.vmem [resolvable:$true] %s425_s27 }
  0x18   : > { %s449_s30 = sshll.u32 %s4231_s29, 4  ;;  %s5030_s1 = sld [smem:[#allocation42_spill]]  ;;  %s4373_s30 = int_to_ptr.vmem [resolvable:$true] %s449_s30 }
  0x19   : > { %s5027_s25 = scalar_select %p4358_p3, 1, 0 }
  0x1a   : > { %p3577_p5 = pneg %p4358_p3 }
  0x1b   : > { %5028 = sst [smem:[#allocation40_spill]] %s5027_s25 }
  0x1c   : > { %p4367_p6 = pnand %p3577_p5, %p5016_p1 }
  0x1e   : > { %s3711_s22 = scalar_lea.hbm %s5030_s1, 8192  ;;  %p4383_p8 = pneg %p4367_p6 }
  0x1f   : > { %p3712_p7 = scmp.ne.s32.totalorder %s5030_s1, %s3711_s22  ;;  %p3718_p11 = scmp.lt.u32.totalorder %s3711_s22, %s5030_s1 }
  0x21   : > { %p3714_p9 = pnand %p4383_p8, %p3712_p7 }
  0x23   : > { %p3715_p10 = pneg %p3714_p9 }
  0x25   : > { %p3720_p12 = pnand %p3718_p11, %p3715_p10 }
  0x27   : > { %3723 = shalt.err (!%p3720_p12)
}
  0x28   : > { %s3724_s15 = scalar_lea.vmem %s4356_s23, 8192  ;;  %p3732_p5 = scmp.lt.s32.totalorder %s4356_s23, %s4356_s23 }
  0x29   : > { %p3725_p13 = scmp.ne.s32.totalorder %s4356_s23, %s3724_s15  ;;  %p3733_p4 = scmp.lt.s32.totalorder %s3724_s15, %s3724_s15 }
  0x2b   : > { %p3727_p0 = pnand %p3725_p13, %p4383_p8  ;;  %p3734_p7 = por %p3733_p4, %p3732_p5 }
  0x2d   : > { %p3728_p2 = pneg %p3727_p0 }
  0x2f   : > { %p3735_p9 = pnand %p3734_p7, %p3728_p2 }
  0x31   : > { %3738 = shalt.err (!%p3735_p9)
}
  0x32   : > { %s4232_s25 = smov 128   ;;  %s4233_s0 = smov 8  }
  0x33   : > { %3580 = dma.hbm_to_vmem [thread:$0]  (!%p4367_p6), %s5030_s1, 8192, %s4356_s23, [#allocation6], %s4232_s25, %s4232_s25, %s4233_s0  }
  0x34   : > { %s3739_s15 = scalar_lea.hbm %s4995_s3, 8064 }
  0x35   : > { %p3740_p4 = scmp.ne.s32.totalorder %s4995_s3, %s3739_s15  ;;  %p3746_p12 = scmp.lt.u32.totalorder %s3739_s15, %s4995_s3 }
  0x37   : > { %p3742_p10 = pnand %p3740_p4, %p4383_p8 }
  0x39   : > { %p3743_p11 = pneg %p3742_p10 }
  0x3b   : > { %p3748_p13 = pnand %p3746_p12, %p3743_p11 }
  0x3d   : > { %3751 = shalt.err (!%p3748_p13)
}
  0x3e   : > { %s3752_s23 = scalar_lea.vmem %s4371_s27, 8064  ;;  %p3760_p7 = scmp.lt.s32.totalorder %s4371_s27, %s4371_s27 }
  0x3f   : > { %p3753_p0 = scmp.ne.s32.totalorder %s4371_s27, %s3752_s23  ;;  %p3761_p9 = scmp.lt.s32.totalorder %s3752_s23, %s3752_s23 }
  0x41   : > { %p3755_p2 = pnand %p3753_p0, %p4383_p8  ;;  %p3762_p4 = por %p3761_p9, %p3760_p7 }
  0x43   : > { %p3756_p5 = pneg %p3755_p2 }
  0x45   : > { %p3763_p10 = pnand %p3762_p4, %p3756_p5 }
  0x47   : > { %3766 = shalt.err (!%p3763_p10)
}
  0x48   : > { %3586 = dma.hbm_to_vmem [thread:$0]  (!%p4367_p6), %s4995_s3, 8064, %s4371_s27, [#allocation9], %s4232_s25, %s4232_s25, %s4233_s0  }
  0x49   : > { %s3767_s16 = scalar_lea.hbm %s4997_s5, 3200 }
  0x4a   : > { %p3768_p11 = scmp.ne.s32.totalorder %s4997_s5, %s3767_s16  ;;  %p3774_p0 = scmp.lt.u32.totalorder %s3767_s16, %s4997_s5 }
  0x4c   : > { %p3770_p12 = pnand %p3768_p11, %p4383_p8 }
  0x4e   : > { %p3771_p13 = pneg %p3770_p12 }
  0x50   : > { %p3776_p2 = pnand %p3774_p0, %p3771_p13 }
  0x52   : > { %3779 = shalt.err (!%p3776_p2)
}
  0x53   : > { %s3780_s27 = scalar_lea.vmem %s4373_s30, 3200  ;;  %p3788_p4 = scmp.lt.s32.totalorder %s4373_s30, %s4373_s30 }
  0x54   : > { %p3781_p5 = scmp.ne.s32.totalorder %s4373_s30, %s3780_s27  ;;  %p3789_p10 = scmp.lt.s32.totalorder %s3780_s27, %s3780_s27 }
  0x56   : > { %p3783_p7 = pnand %p3781_p5, %p4383_p8  ;;  %p3790_p11 = por %p3789_p10, %p3788_p4 }
  0x58   : > { %p3784_p9 = pneg %p3783_p7 }
  0x5a   : > { %p3791_p12 = pnand %p3790_p11, %p3784_p9 }
  0x5c   : > { %3794 = shalt.err (!%p3791_p12)
}
  0x5d   : > { %3592 = dma.hbm_to_vmem [thread:$0]  (!%p4367_p6), %s4997_s5, 3200, %s4373_s30, [#allocation12], %s4232_s25, %s4232_s25, %s4233_s0  }
  0x5e   : > { %s4234_s19 = smov [#allocation14]   ;;  %s4235_s24 = smov [#allocation17]  }
  0x5f   : > { %s474_s20 = sshll.u32 %s4234_s19, 4  ;;  %s495_s16 = sshll.u32 %s4235_s24, 4  ;;  %s475_s20 = int_to_ptr.vmem [resolvable:$true] %s474_s20  ;;  %s496_s16 = int_to_ptr.vmem [resolvable:$true] %s495_s16 }
  0x60   : > { %s3795_s29 = scalar_lea.hbm %s4999_s7, 16 }
  0x61   : > { %p3796_p13 = scmp.ne.s32.totalorder %s4999_s7, %s3795_s29  ;;  %p3802_p5 = scmp.lt.u32.totalorder %s3795_s29, %s4999_s7 }
  0x63   : > { %p3798_p0 = pnand %p3796_p13, %p4383_p8 }
  0x65   : > { %p3799_p2 = pneg %p3798_p0 }
  0x67   : > { %p3804_p7 = pnand %p3802_p5, %p3799_p2 }
  0x69   : > { %3807 = shalt.err (!%p3804_p7)
}
  0x6a   : > { %s3808_s30 = scalar_lea.vmem %s475_s20, 16  ;;  %s3815_s18 = scalar_lea.vmem %s475_s20, 32 }
  0x6b   : > { %p3809_p9 = scmp.ne.s32.totalorder %s475_s20, %s3808_s30  ;;  %p3816_p11 = scmp.lt.s32.totalorder %s475_s20, %s475_s20 }
  0x6c   : > { %p3817_p12 = scmp.lt.s32.totalorder %s3815_s18, %s3808_s30 }
  0x6d   : > { %p3811_p4 = pnand %p3809_p9, %p4383_p8 }
  0x6e   : > { %p3818_p1 = por %p3817_p12, %p3816_p11 }
  0x6f   : > { %p3812_p10 = pneg %p3811_p4 }
  0x71   : > { %p3819_p3 = pnand %p3818_p1, %p3812_p10 }
  0x73   : > { %3822 = shalt.err (!%p3819_p3)
}
  0x74   : > { %3598 = dma.hbm_to_vmem [thread:$0]  (!%p4367_p6), %s4999_s7, 16, %s475_s20, [#allocation15]  }
  0x75   : > { %s3823_s22 = scalar_lea.hbm %s5001_s9, 512 }
  0x76   : > { %p3824_p13 = scmp.ne.s32.totalorder %s5001_s9, %s3823_s22  ;;  %p3830_p3 = scmp.lt.u32.totalorder %s3823_s22, %s5001_s9 }
  0x78   : > { %p3826_p0 = pnand %p3824_p13, %p4383_p8 }
  0x7a   : > { %p3827_p1 = pneg %p3826_p0 }
  0x7c   : > { %p3832_p2 = pnand %p3830_p3, %p3827_p1 }
  0x7e   : > { %3835 = shalt.err (!%p3832_p2)
}
  0x7f   : > { %s3836_s30 = scalar_lea.vmem %s496_s16, 512  ;;  %p3844_p4 = scmp.lt.s32.totalorder %s496_s16, %s496_s16 }
  0x80   : > { %p3837_p5 = scmp.ne.s32.totalorder %s496_s16, %s3836_s30  ;;  %p3845_p10 = scmp.lt.s32.totalorder %s3836_s30, %s3836_s30 }
  0x82   : > { %p3839_p7 = pnand %p3837_p5, %p4383_p8  ;;  %p3846_p11 = por %p3845_p10, %p3844_p4 }
  0x84   : > { %p3840_p9 = pneg %p3839_p7 }
  0x86   : > { %p3847_p12 = pnand %p3846_p11, %p3840_p9 }
  0x88   : > { %3850 = shalt.err (!%p3847_p12)
}
  0x89   : > { %3604 = dma.hbm_to_vmem [thread:$0]  (!%p4367_p6), %s5001_s9, 512, %s496_s16, [#allocation18], %s4232_s25, %s4232_s25, %s4233_s0  }
  0x8a   : > { %s4236_s19 = smov [#allocation20]   ;;  %s4237_s1 = smov [#allocation23]  }
  0x8b   : > { %s519_s24 = sshll.u32 %s4236_s19, 4  ;;  %s543_s17 = sshll.u32 %s4237_s1, 4  ;;  %s520_s24 = int_to_ptr.vmem [resolvable:$true] %s519_s24  ;;  %s544_s17 = int_to_ptr.vmem [resolvable:$true] %s543_s17 }
  0x8c   : > { %s3851_s15 = scalar_lea.hbm %s5003_s11, 512 }
  0x8d   : > { %p3852_p13 = scmp.ne.s32.totalorder %s5003_s11, %s3851_s15  ;;  %p3858_p3 = scmp.lt.u32.totalorder %s3851_s15, %s5003_s11 }
  0x8f   : > { %p3854_p0 = pnand %p3852_p13, %p4383_p8 }
  0x91   : > { %p3855_p1 = pneg %p3854_p0 }
  0x93   : > { %p3860_p2 = pnand %p3858_p3, %p3855_p1 }
  0x95   : > { %3863 = shalt.err (!%p3860_p2)
}
  0x96   : > { %s3864_s16 = scalar_lea.vmem %s520_s24, 512  ;;  %p3872_p4 = scmp.lt.s32.totalorder %s520_s24, %s520_s24 }
  0x97   : > { %p3865_p5 = scmp.ne.s32.totalorder %s520_s24, %s3864_s16  ;;  %p3873_p10 = scmp.lt.s32.totalorder %s3864_s16, %s3864_s16 }
  0x99   : > { %p3867_p7 = pnand %p3865_p5, %p4383_p8  ;;  %p3874_p11 = por %p3873_p10, %p3872_p4 }
  0x9b   : > { %p3868_p9 = pneg %p3867_p7 }
  0x9d   : > { %p3875_p12 = pnand %p3874_p11, %p3868_p9 }
  0x9f   : > { %3878 = shalt.err (!%p3875_p12)
}
  0xa0   : > { %3610 = dma.hbm_to_vmem [thread:$0]  (!%p4367_p6), %s5003_s11, 512, %s520_s24, [#allocation21], %s4232_s25, %s4232_s25, %s4233_s0  }
  0xa1   : > { %s3879_s29 = scalar_lea.hbm %s5005_s13, 512 }
  0xa2   : > { %p3880_p13 = scmp.ne.s32.totalorder %s5005_s13, %s3879_s29  ;;  %p3886_p3 = scmp.lt.u32.totalorder %s3879_s29, %s5005_s13 }
  0xa4   : > { %p3882_p0 = pnand %p3880_p13, %p4383_p8 }
  0xa6   : > { %p3883_p1 = pneg %p3882_p0 }
  0xa8   : > { %p3888_p2 = pnand %p3886_p3, %p3883_p1 }
  0xaa   : > { %3891 = shalt.err (!%p3888_p2)
}
  0xab   : > { %s3892_s20 = scalar_lea.vmem %s544_s17, 512  ;;  %p3900_p4 = scmp.lt.s32.totalorder %s544_s17, %s544_s17 }
  0xac   : > { %p3893_p5 = scmp.ne.s32.totalorder %s544_s17, %s3892_s20  ;;  %p3901_p10 = scmp.lt.s32.totalorder %s3892_s20, %s3892_s20 }
  0xae   : > { %p3895_p7 = pnand %p3893_p5, %p4383_p8  ;;  %p3902_p11 = por %p3901_p10, %p3900_p4 }
  0xb0   : > { %p3896_p9 = pneg %p3895_p7 }
  0xb2   : > { %p3903_p12 = pnand %p3902_p11, %p3896_p9 }
  0xb4   : > { %3906 = shalt.err (!%p3903_p12)
}
  0xb5   : > { %3616 = dma.hbm_to_vmem [thread:$0]  (!%p4367_p6), %s5005_s13, 512, %s544_s17, [#allocation24], %s4232_s25, %s4232_s25, %s4233_s0  }
  0xb6   : > { %s4238_s18 = smov [#allocation7]   ;;  %s4239_s1 = smov [#allocation10]  }
  0xb7   : > { %s415_s19 = sshll.u32 %s4238_s18, 4  ;;  %s439_s22 = sshll.u32 %s4239_s1, 4  ;;  %s416_s19 = int_to_ptr.vmem [resolvable:$true] %s415_s19  ;;  %s440_s22 = int_to_ptr.vmem [resolvable:$true] %s439_s22 }
  0xb8   : > { %s5032_s2 = sld [smem:[#allocation43_spill]] }
  0xbe   : > { %s3907_s27 = scalar_lea.hbm %s5032_s2, 16 }
  0xbf   : > { %p3908_p13 = scmp.ne.s32.totalorder %s5032_s2, %s3907_s27  ;;  %p3914_p3 = scmp.lt.u32.totalorder %s3907_s27, %s5032_s2 }
  0xc1   : > { %p3910_p0 = pnand %p3908_p13, %p4383_p8 }
  0xc3   : > { %p3911_p1 = pneg %p3910_p0 }
  0xc5   : > { %p3916_p2 = pnand %p3914_p3, %p3911_p1 }
  0xc7   : > { %3919 = shalt.err (!%p3916_p2)
}
  0xc8   : > { %s3920_s25 = scalar_lea.vmem %s416_s19, 16  ;;  %s3927_s0 = scalar_lea.vmem %s416_s19, 32 }
  0xc9   : > { %p3921_p5 = scmp.ne.s32.totalorder %s416_s19, %s3920_s25  ;;  %p3928_p4 = scmp.lt.s32.totalorder %s416_s19, %s416_s19 }
  0xca   : > { %p3929_p10 = scmp.lt.s32.totalorder %s3927_s0, %s3920_s25 }
  0xcb   : > { %p3923_p7 = pnand %p3921_p5, %p4383_p8 }
  0xcc   : > { %p3930_p11 = por %p3929_p10, %p3928_p4 }
  0xcd   : > { %p3924_p9 = pneg %p3923_p7 }
  0xcf   : > { %p3931_p12 = pnand %p3930_p11, %p3924_p9 }
  0xd1   : > { %3934 = shalt.err (!%p3931_p12)
}
  0xd2   : > { %3583 = dma.hbm_to_vmem [thread:$0]  (!%p4367_p6), %s5032_s2, 16, %s416_s19, [#allocation6]  }
  0xd3   : > { %s3935_s29 = scalar_lea.hbm %s4996_s4, 16 }
  0xd4   : > { %p3936_p13 = scmp.ne.s32.totalorder %s4996_s4, %s3935_s29  ;;  %p3942_p3 = scmp.lt.u32.totalorder %s3935_s29, %s4996_s4 }
  0xd6   : > { %p3938_p0 = pnand %p3936_p13, %p4383_p8 }
  0xd8   : > { %p3939_p1 = pneg %p3938_p0 }
  0xda   : > { %p3944_p2 = pnand %p3942_p3, %p3939_p1 }
  0xdc   : > { %3947 = shalt.err (!%p3944_p2)
}
  0xdd   : > { %s3948_s20 = scalar_lea.vmem %s440_s22, 16  ;;  %s3955_s19 = scalar_lea.vmem %s440_s22, 32 }
  0xde   : > { %p3949_p5 = scmp.ne.s32.totalorder %s440_s22, %s3948_s20  ;;  %p3956_p4 = scmp.lt.s32.totalorder %s440_s22, %s440_s22 }
  0xdf   : > { %p3957_p10 = scmp.lt.s32.totalorder %s3955_s19, %s3948_s20 }
  0xe0   : > { %p3951_p7 = pnand %p3949_p5, %p4383_p8 }
  0xe1   : > { %p3958_p11 = por %p3957_p10, %p3956_p4 }
  0xe2   : > { %p3952_p9 = pneg %p3951_p7 }
  0xe4   : > { %p3959_p12 = pnand %p3958_p11, %p3952_p9 }
  0xe6   : > { %3962 = shalt.err (!%p3959_p12)
}
  0xe7   : > { %3589 = dma.hbm_to_vmem [thread:$0]  (!%p4367_p6), %s4996_s4, 16, %s440_s22, [#allocation9]  }
  0xe8   : > { %s4240_s0 = smov [#allocation13]   ;;  %s4241_s16 = smov [#allocation16]  }
  0xe9   : > { %s463_s17 = sshll.u32 %s4240_s0, 4  ;;  %s485_s18 = sshll.u32 %s4241_s16, 4  ;;  %s464_s17 = int_to_ptr.vmem [resolvable:$true] %s463_s17  ;;  %s486_s18 = int_to_ptr.vmem [resolvable:$true] %s485_s18 }
  0xea   : > { %s3963_s15 = scalar_lea.hbm %s4998_s6, 16 }
  0xeb   : > { %p3964_p13 = scmp.ne.s32.totalorder %s4998_s6, %s3963_s15  ;;  %p3970_p3 = scmp.lt.u32.totalorder %s3963_s15, %s4998_s6 }
  0xed   : > { %p3966_p0 = pnand %p3964_p13, %p4383_p8 }
  0xef   : > { %p3967_p1 = pneg %p3966_p0 }
  0xf1   : > { %p3972_p2 = pnand %p3970_p3, %p3967_p1 }
  0xf3   : > { %3975 = shalt.err (!%p3972_p2)
}
  0xf4   : > { %s3976_s22 = scalar_lea.vmem %s464_s17, 16  ;;  %s3983_s19 = scalar_lea.vmem %s464_s17, 32 }
  0xf5   : > { %p3977_p5 = scmp.ne.s32.totalorder %s464_s17, %s3976_s22  ;;  %p3984_p4 = scmp.lt.s32.totalorder %s464_s17, %s464_s17 }
  0xf6   : > { %p3985_p10 = scmp.lt.s32.totalorder %s3983_s19, %s3976_s22 }
  0xf7   : > { %p3979_p7 = pnand %p3977_p5, %p4383_p8 }
  0xf8   : > { %p3986_p11 = por %p3985_p10, %p3984_p4 }
  0xf9   : > { %p3980_p9 = pneg %p3979_p7 }
  0xfb   : > { %p3987_p12 = pnand %p3986_p11, %p3980_p9 }
  0xfd   : > { %3990 = shalt.err (!%p3987_p12)
}
  0xfe   : > { %3595 = dma.hbm_to_vmem [thread:$0]  (!%p4367_p6), %s4998_s6, 16, %s464_s17, [#allocation12]  }
  0xff   : > { %s3991_s1 = scalar_lea.hbm %s5000_s8, 16 }
 0x100   : > { %p3992_p13 = scmp.ne.s32.totalorder %s5000_s8, %s3991_s1  ;;  %p3998_p3 = scmp.lt.u32.totalorder %s3991_s1, %s5000_s8 }
 0x102   : > { %p3994_p0 = pnand %p3992_p13, %p4383_p8 }
 0x104   : > { %p3995_p1 = pneg %p3994_p0 }
 0x106   : > { %p4000_p2 = pnand %p3998_p3, %p3995_p1 }
 0x108   : > { %4003 = shalt.err (!%p4000_p2)
}
 0x109   : > { %s4004_s30 = scalar_lea.vmem %s486_s18, 16  ;;  %s4011_s17 = scalar_lea.vmem %s486_s18, 32 }
 0x10a   : > { %p4005_p5 = scmp.ne.s32.totalorder %s486_s18, %s4004_s30  ;;  %p4012_p4 = scmp.lt.s32.totalorder %s486_s18, %s486_s18 }
 0x10b   : > { %p4013_p10 = scmp.lt.s32.totalorder %s4011_s17, %s4004_s30 }
 0x10c   : > { %p4007_p7 = pnand %p4005_p5, %p4383_p8 }
 0x10d   : > { %p4014_p11 = por %p4013_p10, %p4012_p4 }
 0x10e   : > { %p4008_p9 = pneg %p4007_p7 }
 0x110   : > { %p4015_p12 = pnand %p4014_p11, %p4008_p9 }
 0x112   : > { %4018 = shalt.err (!%p4015_p12)
}
 0x113   : > { %3601 = dma.hbm_to_vmem [thread:$0]  (!%p4367_p6), %s5000_s8, 16, %s486_s18, [#allocation15]  }
 0x114   : > { %s4242_s19 = smov [#allocation19]   ;;  %s4243_s25 = smov [#allocation22]  }
 0x115   : > { %s509_s24 = sshll.u32 %s4242_s19, 4  ;;  %s533_s0 = sshll.u32 %s4243_s25, 4  ;;  %s510_s24 = int_to_ptr.vmem [resolvable:$true] %s509_s24  ;;  %s534_s0 = int_to_ptr.vmem [resolvable:$true] %s533_s0 }
 0x116   : > { %s4019_s29 = scalar_lea.hbm %s5002_s10, 16 }
 0x117   : > { %p4020_p13 = scmp.ne.s32.totalorder %s5002_s10, %s4019_s29  ;;  %p4026_p3 = scmp.lt.u32.totalorder %s4019_s29, %s5002_s10 }
 0x119   : > { %p4022_p0 = pnand %p4020_p13, %p4383_p8 }
 0x11b   : > { %p4023_p1 = pneg %p4022_p0 }
 0x11d   : > { %p4028_p2 = pnand %p4026_p3, %p4023_p1 }
 0x11f   : > { %4031 = shalt.err (!%p4028_p2)
}
 0x120   : > { %s4032_s18 = scalar_lea.vmem %s510_s24, 16  ;;  %s4039_s17 = scalar_lea.vmem %s510_s24, 32 }
 0x121   : > { %p4033_p5 = scmp.ne.s32.totalorder %s510_s24, %s4032_s18  ;;  %p4040_p4 = scmp.lt.s32.totalorder %s510_s24, %s510_s24 }
 0x122   : > { %p4041_p10 = scmp.lt.s32.totalorder %s4039_s17, %s4032_s18 }
 0x123   : > { %p4035_p7 = pnand %p4033_p5, %p4383_p8 }
 0x124   : > { %p4042_p11 = por %p4041_p10, %p4040_p4 }
 0x125   : > { %p4036_p9 = pneg %p4035_p7 }
 0x127   : > { %p4043_p12 = pnand %p4042_p11, %p4036_p9 }
 0x129   : > { %4046 = shalt.err (!%p4043_p12)
}
 0x12a   : > { %3607 = dma.hbm_to_vmem [thread:$0]  (!%p4367_p6), %s5002_s10, 16, %s510_s24, [#allocation18]  }
 0x12b   : > { %s4047_s16 = scalar_lea.hbm %s5004_s12, 16 }
 0x12c   : > { %p4048_p13 = scmp.ne.s32.totalorder %s5004_s12, %s4047_s16  ;;  %p4054_p3 = scmp.lt.u32.totalorder %s4047_s16, %s5004_s12 }
 0x12e   : > { %p4050_p0 = pnand %p4048_p13, %p4383_p8 }
 0x130   : > { %p4051_p1 = pneg %p4050_p0 }
 0x132   : > { %p4056_p2 = pnand %p4054_p3, %p4051_p1 }
 0x134   : > { %4059 = shalt.err (!%p4056_p2)
}
 0x135   : > { %s4060_s23 = scalar_lea.vmem %s534_s0, 16  ;;  %s4067_s24 = scalar_lea.vmem %s534_s0, 32 }
 0x136   : > { %p4061_p5 = scmp.ne.s32.totalorder %s534_s0, %s4060_s23  ;;  %p4068_p4 = scmp.lt.s32.totalorder %s534_s0, %s534_s0 }
 0x137   : > { %p4069_p10 = scmp.lt.s32.totalorder %s4067_s24, %s4060_s23 }
 0x138   : > { %p4063_p7 = pnand %p4061_p5, %p4383_p8 }
 0x139   : > { %p4070_p11 = por %p4069_p10, %p4068_p4 }
 0x13a   : > { %p4064_p9 = pneg %p4063_p7 }
 0x13c   : > { %p4071_p12 = pnand %p4070_p11, %p4064_p9 }
 0x13e   : > { %4074 = shalt.err (!%p4071_p12)
}
 0x13f   : > { %3613 = dma.hbm_to_vmem [thread:$0]  (!%p4367_p6), %s5004_s12, 16, %s534_s0, [#allocation21]  }
 0x140   : > { %s4244_s17 = smov [#allocation25]   ;;  %s4075_s25 = scalar_lea.hbm %s5006_s14, 16 }
 0x141   : > { %s557_s20 = sshll.u32 %s4244_s17, 4  ;;  %p4076_p13 = scmp.ne.s32.totalorder %s5006_s14, %s4075_s25  ;;  %s558_s20 = int_to_ptr.vmem [resolvable:$true] %s557_s20 }
 0x142   : > { %p4082_p3 = scmp.lt.u32.totalorder %s4075_s25, %s5006_s14 }
 0x143   : > { %p4078_p0 = pnand %p4076_p13, %p4383_p8 }
 0x145   : > { %p4079_p1 = pneg %p4078_p0 }
 0x147   : > { %p4084_p2 = pnand %p4082_p3, %p4079_p1 }
 0x149   : > { %4087 = shalt.err (!%p4084_p2)
}
 0x14a   : > { %s4088_s0 = scalar_lea.vmem %s558_s20, 16  ;;  %s4095_s27 = scalar_lea.vmem %s558_s20, 32 }
 0x14b   : > { %p4089_p5 = scmp.ne.s32.totalorder %s558_s20, %s4088_s0  ;;  %p4096_p4 = scmp.lt.s32.totalorder %s558_s20, %s558_s20 }
 0x14c   : > { %p4097_p10 = scmp.lt.s32.totalorder %s4095_s27, %s4088_s0 }
 0x14d   : > { %p4091_p7 = pnand %p4089_p5, %p4383_p8 }
 0x14e   : > { %p4098_p11 = por %p4097_p10, %p4096_p4 }
 0x14f   : > { %p4092_p9 = pneg %p4091_p7 }
 0x151   : > { %p4099_p12 = pnand %p4098_p11, %p4092_p9 }
 0x153   : > { %4102 = shalt.err (!%p4099_p12)
}
 0x154   : > { %s5033_s30 = sld [smem:[#allocation38_spill]]  ;;  %s5034_s18 = sld [smem:[#allocation37_spill]] }
 0x155   : > { %s5035_s26 = sld [smem:[#allocation36_spill]]  ;;  %s5036_s17 = sld [smem:[#allocation39_spill]] }
 0x156   : > { %3619 = dma.hbm_to_vmem [thread:$0]  (!%p4367_p6), %s5006_s14, 16, %s558_s20, [#allocation24]  }
 0x157   : > { %s2651_s22 = sadd.s32 4294967294, %s4227_s21   ;;  %s4668_s28 = sadd.s32 1, %s4227_s21  }
 0x158   : > { %s42_s19 = ssub.s32 %s4227_s21, %s4668_s28  ;;  %p53_p0 = scmp.eq.s32.totalorder %s4227_s21, 0 }
 0x159   : > { %p43_p8 = scmp.eq.s32.totalorder %s42_s19, 0  ;;  %p382_p7 = scmp.eq.s32.totalorder %s2651_s22, 1 }
 0x15a   : > { %s45_s25 = sadd.s32 1, %s5033_s30  ;;  %p52_p13 = scmp.ne.s32.totalorder %s5033_s30, %s5034_s18 }
 0x15b   : > { %p58_p1 = scmp.ne.s32.totalorder %s5034_s18, %s5035_s26  ;;  %p5038_p2 = scmp.eq.s32.totalorder %s5036_s17, 0 }
 0x15c   : > { %s4679_s16 = scalar_select %p43_p8, %s5033_s30, %s45_s25  }
 0x15d   : > { %p4681_p3 = por %p53_p0, %p52_p13  ;;  %p4687_p6 = por %p5038_p2, %p58_p1 }
 0x15e   : > { %p376_p5 = scmp.eq.s32.totalorder %s5036_s17, 1  ;;  %p3642_p9 = scmp.lt.s32.totalorder %s4227_s21, 2 }
 0x15f   : > { %s568_s29 = sand.u32 1, %s5033_s30   ;;  %p4698_p10 = por %p382_p7, %p58_p1 }
 0x160   : > { %p4694_p4 = por %p376_p5, %p52_p13  ;;  %s2668_s27 = sshll.u32 %s568_s29, 3 }
 0x161   : > { %s5041_s0 = scalar_select %p4698_p10, 1, 0 }
 0x162   : > { %s5040_s15 = scalar_select %p4694_p4, 1, 0 }
 0x163   : > { %s2669_s23 = sshll.u32 %s4227_s21, 7  ;;  %s5042_s26 = sld [smem:[#allocation41_spill]] }
 0x164   : > { %s572_s30 = scalar_lea.vmem [#allocation2], %s2668_s27  ;;  %p4712_p11 = pnand %p3642_p9, %p4681_p3 }
 0x165   : > { %s579_s17 = sshll.u32 %s572_s30, 4  ;;  %s569_s25 = scalar_lea.sflag [#allocation3], %s568_s29  ;;  %s4708_s17 = int_to_ptr.vmem [resolvable:$true] %s579_s17 }
 0x166   : > { %p4105_p8 = pneg %p4712_p11 }
 0x169   : > { %s4706_s19 = scalar_lea.hbm %s5042_s26, %s2669_s23  ;;  %s4108_s24 = scalar_lea.hbm %s5042_s26, 256 }
 0x16a   : > { %s4103_s2 = scalar_lea.hbm %s4706_s19, 128  ;;  %p4109_p1 = scmp.lt.u32.totalorder %s4706_s19, %s5042_s26 }
 0x16b   : > { %p4104_p12 = scmp.ne.s32.totalorder %s4706_s19, %s4103_s2  ;;  %p4110_p3 = scmp.lt.u32.totalorder %s4108_s24, %s4103_s2 }
 0x16c   : > { %p4112_p5 = scmp.lt.u32.totalorder %s4103_s2, %s4706_s19 }
 0x16d   : > { %p4106_p13 = pnand %p4105_p8, %p4104_p12  ;;  %p4111_p2 = por %p4110_p3, %p4109_p1 }
 0x16f   : > { %p4107_p0 = pneg %p4106_p13  ;;  %p4113_p7 = por %p4112_p5, %p4111_p2 }
 0x171   : > { %p4114_p9 = pnand %p4113_p7, %p4107_p0 }
 0x173   : > { %4117 = shalt.err (!%p4114_p9)
}
 0x174   : > { %s4118_s29 = scalar_lea.vmem %s4708_s17, 128  ;;  %s4245_s30 = smov [#allocation2]  }
 0x175   : > { %p4119_p12 = scmp.ne.s32.totalorder %s4708_s17, %s4118_s29  ;;  %s4123_s27 = sshll.u32 %s4245_s30, 4  ;;  %s4124_s27 = int_to_ptr.vmem [resolvable:$false] %s4123_s27 }
 0x176   : > { %s4125_s23 = scalar_lea.vmem %s4124_s27, 256  ;;  %p4126_p4 = scmp.lt.s32.totalorder %s4708_s17, %s4124_s27 }
 0x177   : > { %p4121_p13 = pnand %p4119_p12, %p4105_p8  ;;  %p4127_p1 = scmp.lt.s32.totalorder %s4125_s23, %s4118_s29 }
 0x179   : > { %p4122_p10 = pneg %p4121_p13  ;;  %p4128_p3 = por %p4127_p1, %p4126_p4 }
 0x17b   : > { %p4129_p2 = pnand %p4128_p3, %p4122_p10 }
 0x17d   : > { %4132 = shalt.err (!%p4129_p2)
}
 0x17e   : > { %3623 = dma.hbm_to_vmem [thread:$0]  (!%p4712_p11), %s4706_s19, 128, %s4708_s17, %s569_s25  }
 0x17f   : > { %s5044_s2 = sld [smem:[#allocation40_spill]] }
 0x185   : > { %p5045_p0 = scmp.ne.s32.totalorder %s5044_s2, 0 }
 0x186   : > { %s5046_s24 = sld [smem:[#allocation37_spill]] (!%p5045_p0) }
 0x187   : > { %588 = sbr.rel (%p5045_p0) target bundleno = 2209 (0x8a1), region = 80 }
 0x18c   : > { %s4744_s1 = sand.u32 (!%p5045_p0), 1, %s5046_s24  }
 0x18d   : > { %s2671_s18 = sshll.u32 (!%p5045_p0), %s4744_s1, 3  ;;  %s591_s30 = scalar_lea.sflag (!%p5045_p0), [#allocation3], %s4744_s1 }
 0x18e   : > { %s4748_s29 = scalar_lea.vmem [#allocation2], %s2671_s18 }
 0x18f   : > { %4178 = dma.done.wait (%p4687_p6), %s591_s30, 128  }
 0x190   : > { %4180 = vsyncadd (%p4687_p6), %s591_s30, 4294967168  ;;  %s5047_s22 = sld [smem:[#allocation39_spill]] }
 0x196   : > { %p5048_p4 = scmp.eq.s32.totalorder %s5047_s22, 0 }
 0x198   : > { %4182 = dma.done.wait (%p5048_p4), [#allocation6], 8208   ;;  %p5049_p10 = pmov %p5048_p4 }
 0x199   : > { %p5050_p11 = pmov %p5048_p4 }
 0x19a   : > { %4184 = vsyncadd (%p5049_p10), [#allocation6], 4294959088 }
 0x19b   : > { %4186 = dma.done.wait (%p5050_p11), [#allocation9], 8080   ;;  %p5051_p8 = pmov %p5048_p4 }
 0x19c   : > { %p5052_p5 = pmov %p5048_p4 }
 0x19d   : > { %4188 = vsyncadd (%p5051_p8), [#allocation9], 4294959216 }
 0x19e   : > { %4190 = dma.done.wait (%p5052_p5), [#allocation12], 3216   ;;  %p5053_p7 = pmov %p5048_p4 }
 0x19f   : > { %p5054_p6 = pmov %p5048_p4 }
 0x1a0   : > { %4192 = vsyncadd (%p5053_p7), [#allocation12], 4294964080 }
 0x1a1   : > { %4194 = dma.done.wait (%p5054_p6), [#allocation15], 32   ;;  %p5055_p9 = pmov %p5048_p4 }
 0x1a2   : > { %p5056_p12 = pmov %p5048_p4 }
 0x1a3   : > { %4196 = vsyncadd (%p5055_p9), [#allocation15], 4294967264 }
 0x1a4   : > { %4198 = dma.done.wait (%p5056_p12), [#allocation18], 528   ;;  %p5057_p13 = pmov %p5048_p4 }
 0x1a5   : > { %p5058_p1 = pmov %p5048_p4 }
 0x1a6   : > { %4200 = vsyncadd (%p5057_p13), [#allocation18], 4294966768 }
 0x1a7   : > { %4202 = dma.done.wait (%p5058_p1), [#allocation21], 528   ;;  %p5059_p3 = pmov %p5058_p1 }
 0x1a8   : > { %p5060_p2 = pmov %p5058_p1 }
 0x1a9   : > { %4204 = vsyncadd (%p5059_p3), [#allocation21], 4294966768 }
 0x1aa   : > { %4206 = dma.done.wait (%p5060_p2), [#allocation24], 528   ;;  %p5061_p0 = pmov %p5058_p1 }
 0x1ab   : > { %v4246_v0 = vmov 0.0|0.0   ;;  %vm4247_vm0 = vmmov 0   ;;  %v4248_v1 = vmov 0.0   ;;  %v714_v2 = vld [vmem:[#allocation5 + $0x80] sm:$0xff]  ;;  %v715_v3 = vld [vmem:[#allocation5 + $0x88] sm:$0xff]  ;;  %v716_v7 = vld [vmem:[#allocation5 + $0x90] sm:$0xff] }
 0x1ac   : > { %4208 = vsyncadd (%p5061_p0), [#allocation24], 4294966768  ;;  %3284 = vmatprep.subr.bf16.mxu0 %v4246_v0  ;;  %3308 = vmatprep.subr.bf16.mxu1 %v4246_v0  ;;  %v697_v4 = vld [vmem:[#allocation5] sm:$0xff]  ;;  %v3285_v5 = vpack.c.bf16 %v715_v3, %v714_v2  ;;  %v698_v6 = vld [vmem:[#allocation5 + $0x8] sm:$0xff]  ;;  %vm1073_vm1 = vcmask 457728   ;;  %vm1811_vm2 = vcmask 326656  }
 0x1ad   : > { %2925 = vmatprep.mubr.msk.f32.mxu0 %vm4247_vm0, %v4248_v1  ;;  %2960 = vmatprep.mubr.msk.f32.mxu1 %vm4247_vm0, %v4248_v1  ;;  %v717_v8 = vld [vmem:[#allocation5 + $0x98] sm:$0xff]  ;;  %v3309_v9 = vpack.c.bf16 %v698_v6, %v697_v4  ;;  %v699_v10 = vld [vmem:[#allocation5 + $0x10] sm:$0xff]  ;;  %v718_v14 = vld [vmem:[#allocation5 + $0xa0] sm:$0xff]  ;;  %vm2182_vm3 = vcmask 253952   ;;  %vm2206_vm4 = vcmask 261120   ;;  %s2705_s20 = sshll.u32 %s5047_s22, 4 }
 0x1ae   : > { %v700_v11 = vld [vmem:[#allocation5 + $0x18] sm:$0xff]  ;;  %3286 = vmatpush3.bf16.msra.mxu0 %v3285_v5  ;;  %v3288_v12 = vpack.c.bf16 %v717_v8, %v716_v7  ;;  %v719_v15 = vld [vmem:[#allocation5 + $0xa8] sm:$0xff]  ;;  %v701_v16 = vld [vmem:[#allocation5 + $0x20] sm:$0xff]  ;;  %s695_s19 = scalar_lea.vmem [#allocation26], %s4744_s1  ;;  %s5062_s23 = sld [smem:[#allocation44_spill]] }
 0x1af   : > { %3310 = vmatpush3.bf16.msra.mxu1 %v3309_v9  ;;  %3287 = vmatprep.subr.bf16.mxu0 %v4246_v0  ;;  %v3312_v13 = vpack.c.bf16 %v700_v11, %v699_v10  ;;  %v702_v17 = vld [vmem:[#allocation5 + $0x28] sm:$0xff]  ;;  %v3291_v18 = vpack.c.bf16 %v719_v15, %v718_v14  ;;  %v720_v20 = vld [vmem:[#allocation5 + $0xb0] sm:$0xff]  ;;  %v721_v21 = vld [vmem:[#allocation5 + $0xb8] sm:$0xff]  ;;  %s2452_s17 = sshll.u32 %s695_s19, 4  ;;  %s2440_s24 = scalar_lea.sflag [#allocation4], %s4744_s1  ;;  %s4950_s17 = int_to_ptr.vmem [resolvable:$true] %s2452_s17 }
 0x1b0   : > { %3311 = vmatprep.subr.bf16.mxu1 %v4246_v0  ;;  %v3315_v19 = vpack.c.bf16 %v702_v17, %v701_v16  ;;  %v703_v22 = vld [vmem:[#allocation5 + $0x30] sm:$0xff]  ;;  %v704_v23 = vld [vmem:[#allocation5 + $0x38] sm:$0xff]  ;;  %v3294_v24 = vpack.c.bf16 %v721_v21, %v720_v20  ;;  %v722_v26 = vld [vmem:[#allocation5 + $0xc0] sm:$0xff]  ;;  %s4133_s18 = scalar_lea.vmem %s4950_s17, 16  ;;  %p5063_p10 = scmp.ne.s32.totalorder %s5040_s15, 0 }
 0x1b1   : > { %v3318_v25 = vpack.c.bf16 %v704_v23, %v703_v22  ;;  %v723_v27 = vld [vmem:[#allocation5 + $0xc8] sm:$0xff]  ;;  %v705_v28 = vld [vmem:[#allocation5 + $0x40] sm:$0xff]  ;;  %v724_v32 = vld [vmem:[#allocation5 + $0xd0] sm:$0xff]  ;;  %p4134_p4 = scmp.ne.s32.totalorder %s4950_s17, %s4133_s18  ;;  %s4249_s30 = smov [#allocation26]  }
 0x1b2   : > { %3289 = vmatpush3.bf16.msra.mxu0 %v3288_v12  ;;  %v706_v29 = vld [vmem:[#allocation5 + $0x48] sm:$0xff]  ;;  %v3297_v30 = vpack.c.bf16 %v723_v27, %v722_v26  ;;  %v725_v33 = vld [vmem:[#allocation5 + $0xd8] sm:$0xff]  ;;  %v707_v34 = vld [vmem:[#allocation5 + $0x50] sm:$0xff] }
 0x1b3   : > { %3313 = vmatpush3.bf16.msra.mxu1 %v3312_v13  ;;  %3290 = vmatprep.subr.bf16.mxu0 %v4246_v0  ;;  %v3321_v31 = vpack.c.bf16 %v706_v29, %v705_v28  ;;  %v708_v35 = vld [vmem:[#allocation5 + $0x58] sm:$0xff]  ;;  %v3300_v36 = vpack.c.bf16 %v725_v33, %v724_v32  ;;  %v726_v38 = vld [vmem:[#allocation5 + $0xe0] sm:$0xff]  ;;  %v727_v39 = vld [vmem:[#allocation5 + $0xe8] sm:$0xff]  ;;  %p4135_p11 = pnand %p4134_p4, %p5063_p10 }
 0x1b4   : > { %3314 = vmatprep.subr.bf16.mxu1 %v4246_v0  ;;  %v3324_v37 = vpack.c.bf16 %v708_v35, %v707_v34  ;;  %v709_v40 = vld [vmem:[#allocation5 + $0x60] sm:$0xff]  ;;  %v710_v41 = vld [vmem:[#allocation5 + $0x68] sm:$0xff]  ;;  %v3303_v42 = vpack.c.bf16 %v727_v39, %v726_v38  ;;  %v728_v44 = vld [vmem:[#allocation5 + $0xf0] sm:$0xff]  ;;  %s4948_s2 = scalar_lea.hbm %s5062_s23, %s2705_s20 }
 0x1b5   : > { %v3327_v43 = vpack.c.bf16 %v710_v41, %v709_v40  ;;  %v729_v45 = vld [vmem:[#allocation5 + $0xf8] sm:$0xff]  ;;  %v711_v46 = vld [vmem:[#allocation5 + $0x70] sm:$0xff]  ;;  %v871_v50 = vld [vmem:[#allocation5 + $0x100] sm:$0xff]  ;;  %p4136_p8 = pneg %p4135_p11 }
 0x1b6   : > { %3292 = vmatpush3.bf16.msra.mxu0 %v3291_v18  ;;  %v712_v47 = vld [vmem:[#allocation5 + $0x78] sm:$0xff]  ;;  %v3306_v48 = vpack.c.bf16 %v729_v45, %v728_v44  ;;  %v872_v51 = vld [vmem:[#allocation5 + $0x108] sm:$0xff]  ;;  %v962_v52 = vld [vmem:[#allocation5 + $0x180] sm:$0xff] }
 0x1b7   : > { %3316 = vmatpush3.bf16.msra.mxu1 %v3315_v19  ;;  %3293 = vmatprep.subr.bf16.mxu0 %v4246_v0  ;;  %v3330_v49 = vpack.c.bf16 %v712_v47, %v711_v46  ;;  %v963_v53 = vld [vmem:[#allocation5 + $0x188] sm:$0xff]  ;;  %v4803_v54 = vld [vmem:[%s4748_s29] sm:$0xff]  ;;  %v3333_v55 = vpack.c.bf16 %v872_v51, %v871_v50  ;;  %v875_v63 = vld [vmem:[#allocation5 + $0x120] sm:$0xff]  ;;  %s4137_s29 = sshll.u32 %s4249_s30, 4  ;;  %s4138_s29 = int_to_ptr.vmem [resolvable:$false] %s4137_s29 }
 0x1b8   : > { %3317 = vmatprep.subr.bf16.mxu1 %v4246_v0  ;;  %v3357_v56 = vpack.c.bf16 %v963_v53, %v962_v52  ;;  %v873_v57 = vld [vmem:[#allocation5 + $0x110] sm:$0xff]  ;;  %v874_v58 = vld [vmem:[#allocation5 + $0x118] sm:$0xff]  ;;  %v876_v2 = vld [vmem:[#allocation5 + $0x128] sm:$0xff]  ;;  %s4139_s22 = scalar_lea.vmem %s4138_s29, 32  ;;  %p4140_p5 = scmp.lt.s32.totalorder %s4950_s17, %s4138_s29 }
 0x1b9   : > { %v964_v59 = vld [vmem:[#allocation5 + $0x190] sm:$0xff]  ;;  %v965_v60 = vld [vmem:[#allocation5 + $0x198] sm:$0xff]  ;;  %v3336_v61 = vpack.c.bf16 %v874_v58, %v873_v57  ;;  %v966_v3 = vld [vmem:[#allocation5 + $0x1a0] sm:$0xff]  ;;  %v3339_v5 = vpack.c.bf16 %v876_v2, %v875_v63  ;;  %p4141_p7 = scmp.lt.s32.totalorder %s4139_s22, %s4133_s18 }
 0x1ba   : > { %3295 = vmatpush3.bf16.msra.mxu0 %v3294_v24  ;;  %v3360_v62 = vpack.c.bf16 %v965_v60, %v964_v59  ;;  %v967_v4 = vld [vmem:[#allocation5 + $0x1a8] sm:$0xff]  ;;  %v877_v7 = vld [vmem:[#allocation5 + $0x130] sm:$0xff]  ;;  %v878_v8 = vld [vmem:[#allocation5 + $0x138] sm:$0xff] }
 0x1bb   : > { %3319 = vmatpush3.bf16.msra.mxu1 %v3318_v25  ;;  %3296 = vmatprep.subr.bf16.mxu0 %v4246_v0  ;;  %v3363_v6 = vpack.c.bf16 %v967_v4, %v966_v3  ;;  %v968_v9 = vld [vmem:[#allocation5 + $0x1b0] sm:$0xff]  ;;  %v969_v10 = vld [vmem:[#allocation5 + $0x1b8] sm:$0xff]  ;;  %v3342_v11 = vpack.c.bf16 %v878_v8, %v877_v7  ;;  %v879_v13 = vld [vmem:[#allocation5 + $0x140] sm:$0xff]  ;;  %p4142_p6 = por %p4141_p7, %p4140_p5 }
 0x1bc   : > { %3320 = vmatprep.subr.bf16.mxu1 %v4246_v0  ;;  %v3366_v12 = vpack.c.bf16 %v969_v10, %v968_v9  ;;  %v880_v14 = vld [vmem:[#allocation5 + $0x148] sm:$0xff]  ;;  %v970_v15 = vld [vmem:[#allocation5 + $0x1c0] sm:$0xff]  ;;  %v881_v19 = vld [vmem:[#allocation5 + $0x150] sm:$0xff] }
 0x1bd   : > { %v971_v16 = vld [vmem:[#allocation5 + $0x1c8] sm:$0xff]  ;;  %v3345_v17 = vpack.c.bf16 %v880_v14, %v879_v13  ;;  %v882_v20 = vld [vmem:[#allocation5 + $0x158] sm:$0xff]  ;;  %v972_v21 = vld [vmem:[#allocation5 + $0x1d0] sm:$0xff]  ;;  %p4143_p9 = pnand %p4142_p6, %p4136_p8 }
 0x1be   : > { %3298 = vmatpush3.bf16.msra.mxu0 %v3297_v30  ;;  %v3369_v18 = vpack.c.bf16 %v971_v16, %v970_v15  ;;  %v973_v22 = vld [vmem:[#allocation5 + $0x1d8] sm:$0xff]  ;;  %v3348_v23 = vpack.c.bf16 %v882_v20, %v881_v19  ;;  %v883_v25 = vld [vmem:[#allocation5 + $0x160] sm:$0xff]  ;;  %v884_v26 = vld [vmem:[#allocation5 + $0x168] sm:$0xff] }
 0x1bf   : > { %3322 = vmatpush3.bf16.msra.mxu1 %v3321_v31  ;;  %3299 = vmatprep.subr.bf16.mxu0 %v4246_v0  ;;  %v3372_v24 = vpack.c.bf16 %v973_v22, %v972_v21  ;;  %v974_v27 = vld [vmem:[#allocation5 + $0x1e0] sm:$0xff]  ;;  %v975_v28 = vld [vmem:[#allocation5 + $0x1e8] sm:$0xff]  ;;  %v3351_v29 = vpack.c.bf16 %v884_v26, %v883_v25  ;;  %v885_v31 = vld [vmem:[#allocation5 + $0x170] sm:$0xff] }
 0x1c0   : > { %3323 = vmatprep.subr.bf16.mxu1 %v4246_v0  ;;  %v3375_v30 = vpack.c.bf16 %v975_v28, %v974_v27  ;;  %v886_v32 = vld [vmem:[#allocation5 + $0x178] sm:$0xff]  ;;  %v976_v33 = vld [vmem:[#allocation5 + $0x1f0] sm:$0xff]  ;;  %v1067_v39 = vld [vmem:[#allocation8 + $0x40] sm:$0xff] }
 0x1c1   : > { %v977_v34 = vld [vmem:[#allocation5 + $0x1f8] sm:$0xff]  ;;  %v3354_v35 = vpack.c.bf16 %v886_v32, %v885_v31  ;;  %v1058_v40 = vld [vmem:[#allocation8] sm:$0xff]  ;;  %v1297_v10 = vld [vmem:[#allocation8 + $0xa8] sm:$0xff] }
 0x1c2   : > { %3301 = vmatpush3.bf16.msra.mxu0 %v3300_v36  ;;  %v3378_v36 = vpack.c.bf16 %v977_v34, %v976_v33  ;;  %v1066_v38 = vld [vmem:[#allocation8 + $0x38] sm:$0xff]  ;;  %v1069_v44 = vld [vmem:[#allocation8 + $0x50] sm:$0xff]  ;;  %v1071_v51 = vld [vmem:[#allocation8 + $0x60] sm:$0xff] }
 0x1c3   : > { %3325 = vmatpush3.bf16.msra.mxu1 %v3324_v37  ;;  %3302 = vmatprep.subr.bf16.mxu0 %v4246_v0  ;;  %v888_v37 = vrot.slane %v4803_v54, 1  ;;  %v3381_v41 = vpack.c.bf16 %v1067_v39, %v1066_v38  ;;  %v1060_v46 = vld [vmem:[#allocation8 + $0x10] sm:$0xff]  ;;  %v1061_v47 = vld [vmem:[#allocation8 + $0x18] sm:$0xff]  ;;  %v1062_v52 = vld [vmem:[#allocation8 + $0x20] sm:$0xff] }
 0x1c4   : > { %3326 = vmatprep.subr.bf16.mxu1 %v4246_v0  ;;  %v1070_v50 = vld [vmem:[#allocation8 + $0x58] sm:$0xff]  ;;  %v1064_v57 = vld [vmem:[#allocation8 + $0x30] sm:$0xff]  ;;  %v1220_v15 = vld [vmem:[#allocation8 + $0x80] sm:$0xff] }
 0x1c5   : > { %v3387_v53 = vpack.c.bf16 %v1071_v51, %v1070_v50  ;;  %v1218_v7 = vld [vmem:[#allocation8 + $0x70] sm:$0xff]  ;;  %v1219_v9 = vld [vmem:[#allocation8 + $0x78] sm:$0xff]  ;;  %v1300_v19 = vld [vmem:[#allocation8 + $0xc0] sm:$0xff] }
 0x1c6   : > { %3304 = vmatpush3.bf16.msra.mxu0 %v3303_v42  ;;  %v1059_v42 = vld [vmem:[#allocation8 + $0x8] sm:$0xff]  ;;  %v3399_v13 = vpack.c.bf16 %v1219_v9, %v1218_v7  ;;  %v1222_v22 = vld [vmem:[#allocation8 + $0x90] sm:$0xff]  ;;  %v1379_v28 = vld [vmem:[#allocation8 + $0xe0] sm:$0xff] }
 0x1c7   : > { %3328 = vmatpush3.bf16.msra.mxu1 %v3327_v43  ;;  %3305 = vmatprep.subr.bf16.mxu0 %v4246_v0  ;;  %v1068_v43 = vld [vmem:[#allocation8 + $0x48] sm:$0xff]  ;;  %v3390_v45 = vpack.c.bf16 %v1059_v42, %v1058_v40  ;;  %v1302_v25 = vld [vmem:[#allocation8 + $0xd0] sm:$0xff]  ;;  %v1459_v31 = vld [vmem:[#allocation8 + $0x120] sm:$0xff] }
 0x1c8   : > { %3329 = vmatprep.subr.bf16.mxu1 %v4246_v0  ;;  %v1224_v32 = vld [vmem:[#allocation8 + $0xa0] sm:$0xff]  ;;  %v1303_v33 = vld [vmem:[#allocation8 + $0xd8] sm:$0xff]  ;;  %v1460_v39 = vld [vmem:[#allocation8 + $0x128] sm:$0xff] }
 0x1c9   : > { %v1382_v38 = vld [vmem:[#allocation8 + $0xf8] sm:$0xff]  ;;  %v1461_v40 = vld [vmem:[#allocation8 + $0x130] sm:$0xff]  ;;  %v1619_v51 = vld [vmem:[#allocation8 + $0x188] sm:$0xff] }
 0x1ca   : > { %3307 = vmatpush3.bf16.msra.mxu0 %v3306_v48  ;;  %v3384_v48 = vpack.c.bf16 %v1069_v44, %v1068_v43  ;;  %v3429_v42 = vpack.c.bf16 %v1461_v40, %v1460_v39  ;;  %v1383_v43 = vld [vmem:[#allocation8 + $0x100] sm:$0xff]  ;;  %v1384_v44 = vld [vmem:[#allocation8 + $0x108] sm:$0xff]  ;;  %v1538_v50 = vld [vmem:[#allocation8 + $0x158] sm:$0xff] }
 0x1cb   : > { %3331 = vmatpush3.bf16.msra.mxu1 %v3330_v49  ;;  %3332 = vmatprep.subr.bf16.mxu0 %v4246_v0  ;;  %v3393_v49 = vpack.c.bf16 %v1061_v47, %v1060_v46  ;;  %v1463_v46 = vld [vmem:[#allocation8 + $0x140] sm:$0xff]  ;;  %v3423_v47 = vpack.c.bf16 %v1384_v44, %v1383_v43 }
 0x1cc   : > { %3356 = vmatprep.subr.bf16.mxu1 %v4246_v0  ;;  %v1698_v7 = vld [vmem:[#allocation8 + $0x1c0] sm:$0xff] }
 0x1cd   : > { %2926 = vmatmul.mubr.f32.vlgmr.msra.gmra.mrb[0].mxu0 %v4803_v54  ;;  %v1543_v9 = vld [vmem:[#allocation8 + $0x180] sm:$0xff] }
 0x1ce   : > { %2961 = vmatmul.mubr.f32.vlgmr.msra.gmra.mrb[0].mxu1 %v4803_v54  ;;  %3334 = vmatpush3.bf16.msra.mxu0 %v3333_v55  ;;  %v1063_v54 = vld [vmem:[#allocation8 + $0x28] sm:$0xff] }
 0x1cf   : > { %3358 = vmatpush3.bf16.msra.mxu1 %v3357_v56  ;;  %3335 = vmatprep.subr.bf16.mxu0 %v4246_v0  ;;  %v3396_v55 = vpack.c.bf16 %v1063_v54, %v1062_v52  ;;  %v1072_v56 = vld [vmem:[#allocation8 + $0x68] sm:$0xff]  ;;  %v1620_v52 = vld [vmem:[#allocation8 + $0x190] sm:$0xff] }
 0x1d0   : > { %3359 = vmatprep.subr.bf16.mxu1 %v4246_v0  ;;  %2995 = vmatprep.mubr.msk.f32.mxu0 %vm4247_vm0, %v4248_v1  ;;  %v1464_v54 = vld [vmem:[#allocation8 + $0x148] sm:$0xff] }
 0x1d1   : > { %3030 = vmatprep.mubr.msk.f32.mxu1 %vm4247_vm0, %v4248_v1 }
 0x1d2   : > { %3337 = vmatpush3.bf16.msra.mxu0 %v3336_v61 }
 0x1d3   : > { %3361 = vmatpush3.bf16.msra.mxu1 %v3360_v62  ;;  %3338 = vmatprep.subr.bf16.mxu0 %v4246_v0 }
 0x1d4   : > { %3362 = vmatprep.subr.bf16.mxu1 %v4246_v0 }
 0x1d6   : > { %3340 = vmatpush3.bf16.msra.mxu0 %v3339_v5  ;;  %v2686_v5 = vld [vmem:[#allocation7] ss:$0 sm:$0xff] }
 0x1d7   : > { %3364 = vmatpush3.bf16.msra.mxu1 %v3363_v6  ;;  %3341 = vmatprep.subr.bf16.mxu0 %v4246_v0 }
 0x1d8   : > { %3365 = vmatprep.subr.bf16.mxu1 %v4246_v0 }
 0x1da   : > { %3343 = vmatpush3.bf16.msra.mxu0 %v3342_v11  ;;  %v1298_v11 = vld [vmem:[#allocation8 + $0xb0] sm:$0xff] }
 0x1db   : > { %3367 = vmatpush3.bf16.msra.mxu1 %v3366_v12  ;;  %3344 = vmatprep.subr.bf16.mxu0 %v4246_v0  ;;  %v3408_v14 = vpack.c.bf16 %v1298_v11, %v1297_v10  ;;  %v1625_v10 = vld [vmem:[#allocation8 + $0x1b8] sm:$0xff] }
 0x1dc   : > { %3368 = vmatprep.subr.bf16.mxu1 %v4246_v0 }
 0x1de   : > { %3346 = vmatpush3.bf16.msra.mxu0 %v3345_v17  ;;  %v1221_v17 = vld [vmem:[#allocation8 + $0x88] sm:$0xff] }
 0x1df   : > { %3370 = vmatpush3.bf16.msra.mxu1 %v3369_v18  ;;  %3347 = vmatprep.subr.bf16.mxu0 %v4246_v0  ;;  %v1299_v18 = vld [vmem:[#allocation8 + $0xb8] sm:$0xff]  ;;  %v3402_v20 = vpack.c.bf16 %v1221_v17, %v1220_v15  ;;  %v1703_v17 = vld [vmem:[#allocation8 + $0x1e8] sm:$0xff] }
 0x1e0   : > { %3371 = vmatprep.subr.bf16.mxu1 %v4246_v0  ;;  %v3411_v21 = vpack.c.bf16 %v1300_v19, %v1299_v18  ;;  %v1704_v19 = vld [vmem:[#allocation8 + $0x1f0] sm:$0xff] }
 0x1e2   : > { %3349 = vmatpush3.bf16.msra.mxu0 %v3348_v23  ;;  %v1223_v23 = vld [vmem:[#allocation8 + $0x98] sm:$0xff] }
 0x1e3   : > { %3373 = vmatpush3.bf16.msra.mxu1 %v3372_v24  ;;  %3350 = vmatprep.subr.bf16.mxu0 %v4246_v0  ;;  %v1301_v24 = vld [vmem:[#allocation8 + $0xc8] sm:$0xff]  ;;  %v3405_v26 = vpack.c.bf16 %v1223_v23, %v1222_v22 }
 0x1e4   : > { %3374 = vmatprep.subr.bf16.mxu1 %v4246_v0  ;;  %v3414_v27 = vpack.c.bf16 %v1302_v25, %v1301_v24  ;;  %v1790_v22 = vld [vmem:[#allocation11 + $0x28] sm:$0xff]  ;;  %v1791_v24 = vld [vmem:[#allocation11 + $0x30] sm:$0xff] }
 0x1e5   : > { %v3468_v25 = vpack.c.bf16 %v1791_v24, %v1790_v22  ;;  %v1808_v22 = vld [vmem:[#allocation11 + $0xb8] sm:$0xff]  ;;  %v1809_v24 = vld [vmem:[#allocation11 + $0xc0] sm:$0xff] }
 0x1e6   : > { %3352 = vmatpush3.bf16.msra.mxu0 %v3351_v29  ;;  %v1380_v29 = vld [vmem:[#allocation8 + $0xe8] sm:$0xff] }
 0x1e7   : > { %3376 = vmatpush3.bf16.msra.mxu1 %v3375_v30  ;;  %3353 = vmatprep.subr.bf16.mxu0 %v4246_v0  ;;  %v1458_v30 = vld [vmem:[#allocation8 + $0x118] sm:$0xff] }
 0x1e8   : > { %3377 = vmatprep.subr.bf16.mxu1 %v4246_v0 }
 0x1ea   : > { %3355 = vmatpush3.bf16.msra.mxu0 %v3354_v35  ;;  %v3417_v35 = vpack.c.bf16 %v1380_v29, %v1379_v28  ;;  %v1792_v29 = vld [vmem:[#allocation11 + $0x38] sm:$0xff] }
 0x1eb   : > { %3379 = vmatpush3.bf16.msra.mxu1 %v3378_v36  ;;  %3380 = vmatprep.subr.bf16.mxu0 %v4246_v0  ;;  %v3426_v36 = vpack.c.bf16 %v1459_v31, %v1458_v30  ;;  %v1793_v30 = vld [vmem:[#allocation11 + $0x40] sm:$0xff] }
 0x1ec   : > { %3389 = vmatprep.subr.bf16.mxu1 %v4246_v0  ;;  %v3471_v31 = vpack.c.bf16 %v1793_v30, %v1792_v29 }
 0x1ed   : > { %2996 = vmatmul.mubr.f32.vlgmr.msra.gmra.mrb[2].mxu0 %v888_v37 }
 0x1ee   : > { %3031 = vmatmul.mubr.f32.vlgmr.msra.gmra.mrb[2].mxu1 %v888_v37  ;;  %3047 = vmatprep.mubr.msk.f32.mxu0 %vm4247_vm0, %v4248_v1  ;;  %v1381_v37 = vld [vmem:[#allocation8 + $0xf0] sm:$0xff] }
 0x1ef   : > { %3064 = vmatprep.mubr.msk.f32.mxu1 %vm4247_vm0, %v4248_v1  ;;  %3382 = vmatpush3.bf16.msra.mxu0 %v3381_v41  ;;  %v3420_v41 = vpack.c.bf16 %v1382_v38, %v1381_v37 }
 0x1f0   : > { %3391 = vmatpush3.bf16.msra.mxu1 %v3390_v45  ;;  %3383 = vmatprep.subr.bf16.mxu0 %v4246_v0  ;;  %v1462_v45 = vld [vmem:[#allocation8 + $0x138] sm:$0xff] }
 0x1f1   : > { %3392 = vmatprep.subr.bf16.mxu1 %v4246_v0 }
 0x1f3   : > { %3385 = vmatpush3.bf16.msra.mxu0 %v3384_v48  ;;  %v3432_v48 = vpack.c.bf16 %v1463_v46, %v1462_v45 }
 0x1f4   : > { %3394 = vmatpush3.bf16.msra.mxu1 %v3393_v49  ;;  %3386 = vmatprep.subr.bf16.mxu0 %v4246_v0  ;;  %v1537_v49 = vld [vmem:[#allocation8 + $0x150] sm:$0xff] }
 0x1f5   : > { %3395 = vmatprep.subr.bf16.mxu1 %v4246_v0 }
 0x1f7   : > { %3388 = vmatpush3.bf16.msra.mxu0 %v3387_v53  ;;  %v1385_v53 = vld [vmem:[#allocation8 + $0x110] sm:$0xff] }
 0x1f8   : > { %3397 = vmatpush3.bf16.msra.mxu1 %v3396_v55  ;;  %3045 = vmatprep.subr.mxu0 %v4248_v1  ;;  %v3435_v55 = vpack.c.bf16 %v1538_v50, %v1537_v49 }
 0x1f9   : > { %3062 = vmatprep.subr.mxu1 %v4248_v1 }
 0x1fb   : > { %3046 = vmatpush3.msra.mxu0 %v1072_v56  ;;  %v3444_v56 = vpack.c.bf16 %v1620_v52, %v1619_v51 }
 0x1fc   : > { %3063 = vmatpush3.msra.mxu1 %v1064_v57  ;;  %3398 = vmatprep.subr.bf16.mxu0 %v4246_v0  ;;  %v1539_v57 = vld [vmem:[#allocation8 + $0x160] sm:$0xff] }
 0x1fd   : > { %3407 = vmatprep.subr.bf16.mxu1 %v4246_v0 }
 0x2a0   : > { %v796_v58 = vpop.f32.mrb[0].mxu0 }
 0x2a1   : > { %v2927_v59 = vpop.f32.mrb[1].mxu0  ;;  %v866_v60 = vpop.f32.mrb[0].mxu1 }
 0x2a2   : > { %v867_v61 = vadd.f32 %v866_v60, %v796_v58  ;;  %v2962_v62 = vpop.f32.mrb[1].mxu1  ;;  %v1540_v58 = vld [vmem:[#allocation8 + $0x168] sm:$0xff]  ;;  %v1621_v59 = vld [vmem:[#allocation8 + $0x198] sm:$0xff]  ;;  %v1622_v60 = vld [vmem:[#allocation8 + $0x1a0] sm:$0xff] }
 0x2a3   : > { %v3447_v62 = vpack.c.bf16 %v1622_v60, %v1621_v59 }
 0x2c0   : > { %v956_v63 = vpop.f32.mrb[2].mxu0 }
 0x2c1   : > { %v960_v2 = vadd.f32 %v956_v63, %v867_v61  ;;  %v2997_v3 = vpop.f32.mrb[3].mxu0  ;;  %v1044_v4 = vpop.f32.mrb[2].mxu1  ;;  %v3438_v61 = vpack.c.bf16 %v1540_v58, %v1539_v57  ;;  %v1541_v63 = vld [vmem:[#allocation8 + $0x170] sm:$0xff]  ;;  %v2696_v58 = vld [vmem:[#allocation10] ss:$0 sm:$0xff] }
 0x2c2   : > { %v3032_v6 = vpop.f32.mrb[3].mxu1  ;;  %v1623_v3 = vld [vmem:[#allocation8 + $0x1a8] sm:$0xff] }
 0x2c3   : > { %v1048_v8 = vadd.f32 %v1044_v4, %v960_v2  ;;  %v1542_v2 = vld [vmem:[#allocation8 + $0x178] sm:$0xff]  ;;  %v1624_v4 = vld [vmem:[#allocation8 + $0x1b0] sm:$0xff] }
 0x2c4   : > { %v3450_v6 = vpack.c.bf16 %v1624_v4, %v1623_v3 }
 0x2c5   : > { %v1056_v12 = vadd.f32 %v2686_v5, %v1048_v8  ;;  %v3441_v5 = vpack.c.bf16 %v1542_v2, %v1541_v63  ;;  %v1699_v8 = vld [vmem:[#allocation8 + $0x1c8] sm:$0xff]  ;;  %v1796_v63 = vld [vmem:[#allocation11 + $0x58] sm:$0xff] }
 0x2c7   : > { %v4842_v16 = vmax.f32 %v1056_v12, 0.0  ;;  %v3453_v12 = vpack.c.bf16 %v1699_v8, %v1698_v7  ;;  %v1800_v8 = vld [vmem:[#allocation11 + $0x78] sm:$0xff] }
 0x2c9   : > { %3048 = vmatmul.mubr.msk.f32.vlgmr.msra.gmra.mrb[4].mxu0 %vm1073_vm1, %v4842_v16  ;;  %3065 = vmatmul.mubr.msk.f32.vlgmr.msra.gmra.mrb[4].mxu1 %vm1073_vm1, %v4842_v16  ;;  %v1304_v34 = vrot.slane %v4842_v16, 1  ;;  %v1544_v11 = vrot.slane %v4842_v16, 2 }
 0x2ca   : > { %3400 = vmatpush3.bf16.msra.mxu0 %v3399_v13  ;;  %3409 = vmatpush3.bf16.msra.mxu1 %v3408_v14  ;;  %v1700_v13 = vld [vmem:[#allocation8 + $0x1d0] sm:$0xff]  ;;  %v1701_v14 = vld [vmem:[#allocation8 + $0x1d8] sm:$0xff] }
 0x2cb   : > { %3401 = vmatprep.subr.bf16.mxu0 %v4246_v0  ;;  %3410 = vmatprep.subr.bf16.mxu1 %v4246_v0  ;;  %v3456_v15 = vpack.c.bf16 %v1701_v14, %v1700_v13  ;;  %v1802_v13 = vld [vmem:[#allocation11 + $0x88] sm:$0xff]  ;;  %v1803_v14 = vld [vmem:[#allocation11 + $0x90] sm:$0xff] }
 0x2cc   : > { %3081 = vmatprep.mubr.msk.f32.mxu0 %vm4247_vm0, %v4248_v1  ;;  %3098 = vmatprep.mubr.msk.f32.mxu1 %vm4247_vm0, %v4248_v1 }
 0x2ce   : > { %3403 = vmatpush3.bf16.msra.mxu0 %v3402_v20  ;;  %3412 = vmatpush3.bf16.msra.mxu1 %v3411_v21  ;;  %v1785_v20 = vld [vmem:[#allocation11] sm:$0xff]  ;;  %v1786_v21 = vld [vmem:[#allocation11 + $0x8] sm:$0xff] }
 0x2cf   : > { %3404 = vmatprep.subr.bf16.mxu0 %v4246_v0  ;;  %3413 = vmatprep.subr.bf16.mxu1 %v4246_v0  ;;  %v3462_v23 = vpack.c.bf16 %v1786_v21, %v1785_v20  ;;  %v1807_v21 = vld [vmem:[#allocation11 + $0xb0] sm:$0xff] }
 0x2d2   : > { %3406 = vmatpush3.bf16.msra.mxu0 %v3405_v26  ;;  %3415 = vmatpush3.bf16.msra.mxu1 %v3414_v27  ;;  %v1787_v26 = vld [vmem:[#allocation11 + $0x10] sm:$0xff]  ;;  %v1788_v27 = vld [vmem:[#allocation11 + $0x18] sm:$0xff] }
 0x2d3   : > { %3079 = vmatprep.subr.mxu0 %v4248_v1  ;;  %3096 = vmatprep.subr.mxu1 %v4248_v1  ;;  %v3465_v28 = vpack.c.bf16 %v1788_v27, %v1787_v26 }
 0x2d6   : > { %3080 = vmatpush3.msra.mxu0 %v1224_v32  ;;  %3097 = vmatpush3.msra.mxu1 %v1303_v33  ;;  %v1789_v32 = vld [vmem:[#allocation11 + $0x20] sm:$0xff]  ;;  %v1794_v33 = vld [vmem:[#allocation11 + $0x48] sm:$0xff] }
 0x2d7   : > { %3082 = vmatmul.mubr.msk.f32.vlgmr.msra.gmra.mrb[6].mxu0 %vm1073_vm1, %v4842_v16  ;;  %3099 = vmatmul.mubr.msk.f32.vlgmr.msra.gmra.mrb[6].mxu1 %vm1073_vm1, %v1304_v34  ;;  %v1702_v16 = vld [vmem:[#allocation8 + $0x1e0] sm:$0xff] }
 0x2d8   : > { %3416 = vmatprep.subr.bf16.mxu0 %v4246_v0  ;;  %3425 = vmatprep.subr.bf16.mxu1 %v4246_v0  ;;  %v3459_v18 = vpack.c.bf16 %v1703_v17, %v1702_v16  ;;  %v1805_v16 = vld [vmem:[#allocation11 + $0xa0] sm:$0xff]  ;;  %v1806_v17 = vld [vmem:[#allocation11 + $0xa8] sm:$0xff] }
 0x2d9   : > { %3418 = vmatpush3.bf16.msra.mxu0 %v3417_v35  ;;  %3427 = vmatpush3.bf16.msra.mxu1 %v3426_v36 }
 0x2da   : > { %3419 = vmatprep.subr.bf16.mxu0 %v4246_v0  ;;  %3428 = vmatprep.subr.bf16.mxu1 %v4246_v0 }
 0x2db   : > { %3115 = vmatprep.mubr.msk.f32.mxu0 %vm4247_vm0, %v4248_v1  ;;  %3132 = vmatprep.mubr.msk.f32.mxu1 %vm4247_vm0, %v4248_v1 }
 0x2dd   : > { %3421 = vmatpush3.bf16.msra.mxu0 %v3420_v41  ;;  %3430 = vmatpush3.bf16.msra.mxu1 %v3429_v42 }
 0x2de   : > { %3422 = vmatprep.subr.bf16.mxu0 %v4246_v0  ;;  %3431 = vmatprep.subr.bf16.mxu1 %v4246_v0 }
 0x2e1   : > { %3424 = vmatpush3.bf16.msra.mxu0 %v3423_v47  ;;  %3433 = vmatpush3.bf16.msra.mxu1 %v3432_v48 }
 0x2e2   : > { %3113 = vmatprep.subr.mxu0 %v4248_v1  ;;  %3130 = vmatprep.subr.mxu1 %v4248_v1 }
 0x2e5   : > { %3114 = vmatpush3.msra.mxu0 %v1385_v53  ;;  %3131 = vmatpush3.msra.mxu1 %v1464_v54 }
 0x2e6   : > { %3116 = vmatmul.mubr.msk.f32.vlgmr.msra.gmra.mrb[8].mxu0 %vm1073_vm1, %v1304_v34  ;;  %3133 = vmatmul.mubr.msk.f32.vlgmr.msra.gmra.mrb[8].mxu1 %vm1073_vm1, %v1304_v34 }
 0x2e7   : > { %3434 = vmatprep.subr.bf16.mxu0 %v4246_v0  ;;  %3443 = vmatprep.subr.bf16.mxu1 %v4246_v0 }
 0x2e8   : > { %3436 = vmatpush3.bf16.msra.mxu0 %v3435_v55  ;;  %3445 = vmatpush3.bf16.msra.mxu1 %v3444_v56 }
 0x2e9   : > { %3437 = vmatprep.subr.bf16.mxu0 %v4246_v0  ;;  %3446 = vmatprep.subr.bf16.mxu1 %v4246_v0 }
 0x2ea   : > { %3149 = vmatprep.mubr.msk.f32.mxu0 %vm4247_vm0, %v4248_v1  ;;  %3166 = vmatprep.mubr.msk.f32.mxu1 %vm4247_vm0, %v4248_v1 }
 0x2ec   : > { %3439 = vmatpush3.bf16.msra.mxu0 %v3438_v61  ;;  %3448 = vmatpush3.bf16.msra.mxu1 %v3447_v62  ;;  %v1795_v62 = vld [vmem:[#allocation11 + $0x50] sm:$0xff] }
 0x2ed   : > { %3440 = vmatprep.subr.bf16.mxu0 %v4246_v0  ;;  %3449 = vmatprep.subr.bf16.mxu1 %v4246_v0  ;;  %v3474_v3 = vpack.c.bf16 %v1796_v63, %v1795_v62  ;;  %v2361_v62 = vld [vmem:[#allocation23 + $0x8] sm:$0xff] }
 0x2f0   : > { %3442 = vmatpush3.bf16.msra.mxu0 %v3441_v5  ;;  %3451 = vmatpush3.bf16.msra.mxu1 %v3450_v6  ;;  %v1797_v5 = vld [vmem:[#allocation11 + $0x60] sm:$0xff]  ;;  %v1798_v6 = vld [vmem:[#allocation11 + $0x68] sm:$0xff] }
 0x2f1   : > { %3147 = vmatprep.subr.mxu0 %v4248_v1  ;;  %3164 = vmatprep.subr.mxu1 %v4248_v1  ;;  %v3477_v7 = vpack.c.bf16 %v1798_v6, %v1797_v5  ;;  %v2362_v6 = vld [vmem:[#allocation23 + $0x10] sm:$0xff] }
 0x2f4   : > { %3148 = vmatpush3.msra.mxu0 %v1543_v9  ;;  %3165 = vmatpush3.msra.mxu1 %v1625_v10  ;;  %v1801_v9 = vld [vmem:[#allocation11 + $0x80] sm:$0xff]  ;;  %v1799_v10 = vld [vmem:[#allocation11 + $0x70] sm:$0xff] }
 0x2f5   : > { %3150 = vmatmul.mubr.msk.f32.vlgmr.msra.gmra.mrb[10].mxu0 %vm1073_vm1, %v1544_v11  ;;  %3167 = vmatmul.mubr.msk.f32.vlgmr.msra.gmra.mrb[10].mxu1 %vm1073_vm1, %v1544_v11 }
 0x2f6   : > { %3452 = vmatprep.subr.bf16.mxu0 %v4246_v0  ;;  %3183 = vmatprep.mubr.msk.f32.mxu0 %vm4247_vm0, %v4248_v1 }
 0x2f7   : > { %3454 = vmatpush3.bf16.msra.mxu0 %v3453_v12  ;;  %3467 = vmatprep.subr.bf16.mxu1 %v4246_v0 }
 0x2f8   : > { %3455 = vmatprep.subr.bf16.mxu0 %v4246_v0  ;;  %3209 = vmatprep.mubr.msk.f32.mxu1 %vm4247_vm0, %v4248_v1 }
 0x2f9   : > { %3469 = vmatpush3.bf16.msra.mxu1 %v3468_v25 }
 0x2fa   : > { %3470 = vmatprep.subr.bf16.mxu1 %v4246_v0 }
 0x2fb   : > { %3457 = vmatpush3.bf16.msra.mxu0 %v3456_v15  ;;  %v3483_v15 = vpack.c.bf16 %v1803_v14, %v1802_v13  ;;  %v2364_v14 = vld [vmem:[#allocation25] sm:$0x1] }
 0x2fc   : > { %3458 = vmatprep.subr.bf16.mxu0 %v4246_v0 }
 0x2fd   : > { %3472 = vmatpush3.bf16.msra.mxu1 %v3471_v31 }
 0x2fe   : > { %3207 = vmatprep.subr.mxu1 %v4248_v1 }
 0x2ff   : > { %3460 = vmatpush3.bf16.msra.mxu0 %v3459_v18  ;;  %v1804_v18 = vld [vmem:[#allocation11 + $0x98] sm:$0xff] }
 0x300   : > { %3181 = vmatprep.subr.mxu0 %v4248_v1 }
 0x301   : > { %3208 = vmatpush3.msra.mxu1 %v1794_v33 }
 0x302   : > { %3473 = vmatprep.subr.bf16.mxu1 %v4246_v0 }
 0x303   : > { %3182 = vmatpush3.msra.mxu0 %v1704_v19  ;;  %v3486_v19 = vpack.c.bf16 %v1806_v17, %v1805_v16 }
 0x304   : > { %3184 = vmatmul.mubr.msk.f32.vlgmr.msra.gmra.mrb[12].mxu0 %vm1073_vm1, %v1544_v11  ;;  %3461 = vmatprep.subr.bf16.mxu0 %v4246_v0  ;;  %v3480_v11 = vpack.c.bf16 %v1801_v9, %v1800_v8  ;;  %v2285_v9 = vld [vmem:[#allocation22] sm:$0x1] }
 0x305   : > { %3196 = vmatprep.mubr.msk.f32.mxu0 %vm4247_vm0, %v4248_v1  ;;  %3463 = vmatpush3.bf16.msra.mxu0 %v3462_v23  ;;  %v3489_v23 = vpack.c.bf16 %v1808_v22, %v1807_v21 }
 0x306   : > { %3464 = vmatprep.subr.bf16.mxu0 %v4246_v0 }
 0x309   : > { %3466 = vmatpush3.bf16.msra.mxu0 %v3465_v28  ;;  %v1810_v28 = vld [vmem:[#allocation13] sm:$0x1] }
 0x30a   : > { %3194 = vmatprep.subr.mxu0 %v4248_v1 }
 0x30d   : > { %3195 = vmatpush3.msra.mxu0 %v1789_v32 }
 0x30e   : > { %3491 = vmatprep.subr.bf16.mxu0 %v4246_v0 }
 0x39c   : > { %v1143_v34 = vpop.f32.mrb[4].mxu0  ;;  %v1213_v35 = vpop.f32.mrb[4].mxu1 }
 0x39d   : > { %v1214_v36 = vadd.f32 %v1213_v35, %v1143_v34  ;;  %v3049_v37 = vpop.f32.mrb[5].mxu0  ;;  %v3066_v38 = vpop.f32.mrb[5].mxu1 }
 0x3aa   : > { %v1291_v39 = vpop.f32.mrb[6].mxu0  ;;  %v1373_v40 = vpop.f32.mrb[6].mxu1 }
 0x3ab   : > { %v1295_v41 = vadd.f32 %v1291_v39, %v1214_v36  ;;  %v3083_v42 = vpop.f32.mrb[7].mxu0  ;;  %v3100_v43 = vpop.f32.mrb[7].mxu1  ;;  %v2201_v39 = vld [vmem:[#allocation17] sm:$0xff] }
 0x3ac   : > { %v2203_v42 = vld [vmem:[#allocation17 + $0x10] sm:$0xff]  ;;  %v2204_v43 = vld [vmem:[#allocation17 + $0x18] sm:$0xff] }
 0x3ad   : > { %v1377_v44 = vadd.f32 %v1373_v40, %v1295_v41  ;;  %v2202_v40 = vld [vmem:[#allocation17 + $0x8] sm:$0xff] }
 0x3ae   : > { %v3492_v41 = vpack.c.bf16 %v2202_v40, %v2201_v39 }
 0x3b9   : > { %v1452_v45 = vpop.f32.mrb[8].mxu0  ;;  %v1531_v46 = vpop.f32.mrb[8].mxu1 }
 0x3ba   : > { %v1456_v47 = vadd.f32 %v1452_v45, %v1377_v44  ;;  %v3117_v48 = vpop.f32.mrb[9].mxu0  ;;  %v3134_v49 = vpop.f32.mrb[9].mxu1  ;;  %v3495_v44 = vpack.c.bf16 %v2204_v43, %v2203_v42 }
 0x3bb   : > { %v2197_v49 = vld [vmem:[#allocation14] sm:$0x1] }
 0x3bc   : > { %v1535_v50 = vadd.f32 %v1531_v46, %v1456_v47 }
 0x3c8   : > { %v1613_v51 = vpop.f32.mrb[10].mxu0  ;;  %v1692_v52 = vpop.f32.mrb[10].mxu1 }
 0x3c9   : > { %v1617_v53 = vadd.f32 %v1613_v51, %v1535_v50  ;;  %v3151_v54 = vpop.f32.mrb[11].mxu0  ;;  %v3168_v55 = vpop.f32.mrb[11].mxu1  ;;  %v2281_v51 = vld [vmem:[#allocation20] sm:$0xff] }
 0x3cb   : > { %v1696_v56 = vadd.f32 %v1692_v52, %v1617_v53  ;;  %v2282_v52 = vld [vmem:[#allocation20 + $0x8] sm:$0xff]  ;;  %v2199_v53 = vld [vmem:[#allocation16] sm:$0x1] }
 0x3cc   : > { %v3498_v55 = vpack.c.bf16 %v2282_v52, %v2281_v51 }
 0x3d7   : > { %v1771_v57 = vpop.f32.mrb[12].mxu0 }
 0x3d8   : > { %v1775_v59 = vadd.f32 %v1771_v57, %v1696_v56  ;;  %v3185_v60 = vpop.f32.mrb[13].mxu0  ;;  %v2283_v57 = vld [vmem:[#allocation20 + $0x10] sm:$0xff] }
 0x3d9   : > { %v2205_v60 = vld [vmem:[#allocation19] sm:$0x1] }
 0x3da   : > { %v1783_v61 = vadd.f32 %v2696_v58, %v1775_v59  ;;  %v2284_v58 = vld [vmem:[#allocation20 + $0x18] sm:$0xff] }
 0x3db   : > { %v3501_v59 = vpack.c.bf16 %v2284_v58, %v2283_v57 }
 0x3dc   : > { %v1784_v2 = vmax.f32 %v1783_v61, 0.0  ;;  %v2360_v61 = vld [vmem:[#allocation23] sm:$0xff] }
 0x3de   : > { %3197 = vmatmul.mubr.msk.f32.vlgmr.msra.gmra.mrb[14].mxu0 %vm1811_vm2, %v1784_v2  ;;  %v1886_v4 = vrot.slane %v1784_v2, 1  ;;  %v1960_v12 = vrot.slane %v1784_v2, 2  ;;  %v2034_v20 = vrot.slane %v1784_v2, 3  ;;  %v2108_v25 = vrot.slane %v1784_v2, 4 }
 0x3df   : > { %3259 = vmatprep.mubr.msk.f32.mxu0 %vm4247_vm0, %v4248_v1  ;;  %3493 = vmatpush3.bf16.msra.mxu0 %v3492_v41 }
 0x3e0   : > { %3210 = vmatmul.mubr.msk.f32.vlgmr.msra.gmra.mrb[12].mxu1 %vm1811_vm2, %v1886_v4  ;;  %3494 = vmatprep.subr.bf16.mxu0 %v4246_v0  ;;  %v3504_v4 = vpack.c.bf16 %v2361_v62, %v2360_v61 }
 0x3e1   : > { %3475 = vmatpush3.bf16.msra.mxu1 %v3474_v3  ;;  %3222 = vmatprep.mubr.msk.f32.mxu1 %vm4247_vm0, %v4248_v1 }
 0x3e2   : > { %3476 = vmatprep.subr.bf16.mxu1 %v4246_v0 }
 0x3e3   : > { %3496 = vmatpush3.bf16.msra.mxu0 %v3495_v44 }
 0x3e4   : > { %3497 = vmatprep.subr.bf16.mxu0 %v4246_v0 }
 0x3e5   : > { %3478 = vmatpush3.bf16.msra.mxu1 %v3477_v7  ;;  %v2363_v7 = vld [vmem:[#allocation23 + $0x18] sm:$0xff] }
 0x3e6   : > { %3220 = vmatprep.subr.mxu1 %v4248_v1  ;;  %v3507_v8 = vpack.c.bf16 %v2363_v7, %v2362_v6 }
 0x3e9   : > { %3221 = vmatpush3.msra.mxu1 %v1799_v10 }
 0x3ea   : > { %3223 = vmatmul.mubr.msk.f32.vlgmr.msra.gmra.mrb[12].mxu1 %vm1811_vm2, %v1960_v12  ;;  %3479 = vmatprep.subr.bf16.mxu1 %v4246_v0 }
 0x3eb   : > { %3481 = vmatpush3.bf16.msra.mxu1 %v3480_v11  ;;  %3235 = vmatprep.mubr.msk.f32.mxu1 %vm4247_vm0, %v4248_v1 }
 0x3ec   : > { %3482 = vmatprep.subr.bf16.mxu1 %v4246_v0 }
 0x3ef   : > { %3484 = vmatpush3.bf16.msra.mxu1 %v3483_v15 }
 0x3f0   : > { %3233 = vmatprep.subr.mxu1 %v4248_v1 }
 0x3f3   : > { %3234 = vmatpush3.msra.mxu1 %v1804_v18 }
 0x3f4   : > { %3236 = vmatmul.mubr.msk.f32.vlgmr.msra.gmra.mrb[12].mxu1 %vm1811_vm2, %v2034_v20  ;;  %3485 = vmatprep.subr.bf16.mxu1 %v4246_v0 }
 0x3f5   : > { %3487 = vmatpush3.bf16.msra.mxu1 %v3486_v19  ;;  %3248 = vmatprep.mubr.msk.f32.mxu1 %vm4247_vm0, %v4248_v1 }
 0x3f6   : > { %3488 = vmatprep.subr.bf16.mxu1 %v4246_v0 }
 0x3f9   : > { %3490 = vmatpush3.bf16.msra.mxu1 %v3489_v23 }
 0x3fa   : > { %3246 = vmatprep.subr.mxu1 %v4248_v1 }
 0x3fd   : > { %3247 = vmatpush3.msra.mxu1 %v1809_v24 }
 0x3fe   : > { %3249 = vmatmul.mubr.msk.f32.vlgmr.msra.gmra.mrb[12].mxu1 %vm1811_vm2, %v2108_v25 }
 0x4b1   : > { %v1881_v26 = vpop.f32.mrb[14].mxu0 }
 0x4b2   : > { %v3198_v27 = vpop.f32.mrb[15].mxu0  ;;  %v1885_v29 = vadd.f32 %v1881_v26, %v1810_v28 }
 0x4d1   : > { %v2177_v30 = vpop.f32.mrb[12].mxu1 }
 0x4d2   : > { %v3510_v31 = vadd.f32 %v2177_v30, %v1885_v29  ;;  %v3250_v32 = vpop.f32.mrb[13].mxu1 }
 0x4d4   : > { %v2183_v33 = vsel %vm2182_vm3, %v3510_v31, 0.0 }
 0x4d5   : > { %2184 = vadd.xlane.f32.xlu0 %v2183_v33 }
 0x562   : > { %v2185_v34 = vpop.xlane.xlu0 %2184 }
 0x563   : > { %v2187_v35 = vmul.f32 0.03125, %v2185_v34 }
 0x565   : > { %v2188_v36 = vsub.f32 %v3510_v31, %v2187_v35 }
 0x567   : > { %v2189_v37 = vmul.f32 %v2188_v36, %v2188_v36 }
 0x569   : > { %v2190_v38 = vsel %vm2182_vm3, %v2189_v37, 0.0 }
 0x56a   : > { %2191 = vadd.xlane.f32.xlu0 %v2190_v38 }
 0x5f7   : > { %v2192_v45 = vpop.xlane.xlu0 %2191 }
 0x5f8   : > { %v2193_v46 = vmul.f32 0.03125, %v2192_v45 }
 0x5fa   : > { %v2194_v47 = vadd.f32 1e-05, %v2193_v46 }
 0x5fc   : > { %3709 = vrsqrt.f32 %v2194_v47 }
 0x606   : > { %v3710_v48 = vpop.eup %3709 }
 0x607   : > { %v2196_v50 = vmul.f32 %v3710_v48, %v2188_v36 }
 0x609   : > { %v2198_v54 = vmul.f32 %v2197_v49, %v2196_v50 }
 0x60b   : > { %v2200_v56 = vadd.f32 %v2199_v53, %v2198_v54 }
 0x60d   : > { %3260 = vmatmul.mubr.msk.f32.vlgmr.msra.gmra.mrb[16].mxu0 %vm2206_vm4, %v2200_v56 }
 0x60e   : > { %3499 = vmatpush3.bf16.msra.mxu0 %v3498_v55  ;;  %3270 = vmatprep.mubr.msk.f32.mxu0 %vm4247_vm0, %v4248_v1 }
 0x60f   : > { %3500 = vmatprep.subr.bf16.mxu0 %v4246_v0 }
 0x612   : > { %3502 = vmatpush3.bf16.msra.mxu0 %v3501_v59 }
 0x613   : > { %3503 = vmatprep.subr.bf16.mxu0 %v4246_v0 }
 0x6e0   : > { %v2276_v63 = vpop.f32.mrb[16].mxu0 }
 0x6e1   : > { %v2277_v2 = vadd.f32 %v2276_v63, %v2205_v60  ;;  %v3261_v3 = vpop.f32.mrb[17].mxu0 }
 0x6e3   : > { %v2280_v5 = vmax.f32 %v2277_v2, 0.0 }
 0x6e5   : > { %3271 = vmatmul.mubr.msk.f32.vlgmr.msra.gmra.mrb[18].mxu0 %vm2206_vm4, %v2280_v5 }
 0x6e6   : > { %3505 = vmatpush3.bf16.msra.mxu0 %v3504_v4  ;;  %3281 = vmatprep.mubr.msk.f32.mxu0 %vm4247_vm0, %v4248_v1 }
 0x6e7   : > { %3506 = vmatprep.subr.bf16.mxu0 %v4246_v0 }
 0x6ea   : > { %3508 = vmatpush3.bf16.msra.mxu0 %v3507_v8 }
 0x7b8   : > { %v2355_v10 = vpop.f32.mrb[18].mxu0 }
 0x7b9   : > { %v2356_v11 = vadd.f32 %v2355_v10, %v2285_v9  ;;  %v3272_v12 = vpop.f32.mrb[19].mxu0 }
 0x7bb   : > { %v2359_v13 = vmax.f32 %v2356_v11, 0.0 }
 0x7bd   : > { %3282 = vmatmul.mubr.msk.f32.vlgmr.msra.gmra.mrb[20].mxu0 %vm2206_vm4, %v2359_v13 }
 0x890   : > { %v2434_v1 = vpop.f32.mrb[20].mxu0 }
 0x891   : > { %v2435_v15 = vadd.f32 %v2434_v1, %v2364_v14  ;;  %v3283_v0 = vpop.f32.mrb[21].mxu0 }
 0x893   : > { %2438 = vst [vmem:[%s695_s19] sm:$0x1] %v2435_v15 }
 0x894   : > { %4146 = shalt.err (!%p4143_p9)
}
 0x895   : > { %s4147_s1 = scalar_lea.hbm %s4948_s2, 16  ;;  %s4151_s25 = scalar_lea.hbm %s5062_s23, 32 }
 0x896   : > { %p4148_p12 = scmp.ne.s32.totalorder %s4948_s2, %s4147_s1  ;;  %p4152_p3 = scmp.lt.u32.totalorder %s4948_s2, %s5062_s23 }
 0x897   : > { %p4153_p2 = scmp.lt.u32.totalorder %s4151_s25, %s4147_s1  ;;  %p4155_p4 = scmp.lt.u32.totalorder %s4147_s1, %s4948_s2 }
 0x898   : > { %p4149_p13 = pnand %p4148_p12, %p5063_p10 }
 0x899   : > { %p4154_p0 = por %p4153_p2, %p4152_p3 }
 0x89a   : > { %p4150_p1 = pneg %p4149_p13 }
 0x89b   : > { %p4156_p11 = por %p4155_p4, %p4154_p0 }
 0x89d   : > { %p4157_p8 = pnand %p4156_p11, %p4150_p1 }
 0x89f   : > { %4160 = shalt.err (!%p4157_p8)
}
 0x8a0   : > { %3575 = dma.vmem_to_hbm [thread:$0]  (%p5063_p10), %s4950_s17, 16, %s4948_s2, %s2440_s24  }
 0x8a1 PF: > { %s5064_s18 = sld [smem:[#allocation36_spill]]  ;;  %p5065_p5 = scmp.ne.s32.totalorder %s5041_s0, 0 }
 0x8a2   : > { %p5066_p7 = scmp.ge.s32.totalorder %s4227_s21, 2 }
 0x8a4   : > { %p3625_p6 = pnand %p5066_p7, %p5065_p5 }
 0x8a7   : > { %s2464_s29 = sand.u32 1, %s5064_s18  }
 0x8a8   : > { %s2465_s22 = scalar_lea.sflag [#allocation4], %s2464_s29 }
 0x8a9   : > { %4210 = dma.done.wait (!%p3625_p6), %s2465_s22, 16  }
 0x8aa   : > { %4212 = vsyncadd (!%p3625_p6), %s2465_s22, 4294967280  ;;  %s5067_s18 = sld [smem:[#allocation37_spill]]  ;;  %s5068_s19 = sld [smem:[#allocation38_spill]] }
 0x8ab   : > { %p35_p9 = scmp.ge.s32.totalorder %s4668_s28, 4   ;;  %s5069_s20 = smov %s4679_s16 }
 0x8ac   : > { %s5070_s21 = smov %s4668_s28 }
 0x8ad   :  { %37 = sbr.rel (!%p35_p9) target bundleno = 17 (0x11), region = 192 }
 0x8b4   :  { %2469 = vsyncpa [#allocation3], 1 }
 0x8b5   :  { %2471 = vsyncpa [#allocation3 + $0x1], 1 }
 0x8b6   :  { %2472 = vsyncpa [#allocation6], 1 }
 0x8b7   :  { %2473 = vsyncpa [#allocation9], 1 }
 0x8b8   :  { %2474 = vsyncpa [#allocation12], 1 }
 0x8b9   :  { %2475 = vsyncpa [#allocation15], 1 }
 0x8ba   :  { %2476 = vsyncpa [#allocation18], 1 }
 0x8bb   :  { %2477 = vsyncpa [#allocation21], 1 }
 0x8bc   :  { %2478 = vsyncpa [#allocation24], 1 }
 0x8bd   :  { %2479 = vsyncpa [#allocation4], 1 }
 0x8be   :  { %2481 = vsyncpa [#allocation4 + $0x1], 1 }

</bundles_post_ra>
